<compile_context>
chip_gen: v5e
topology: v5e:2x2
jax: 0.10.0
libtpu: 0.0.40
codegen_flags: <defaults>
</compile_context>

<pallas_src>
import math

import jax
import jax.numpy as jnp
from jax.experimental import pallas as pl
from jax.experimental.pallas import tpu as pltpu

# ---------------- synthetic ViT config (small, consistent with the module) --
IMG = 16          # spatial
PATCH = 4
CHANS = 3
DIM = 32          # hidden
HEADS = 2
HEAD_DIM = DIM // HEADS
MLP_DIM = 4 * DIM
DEPTH = 3
N_LAST_BLOCKS = 2
NUM_PATCHES = (IMG // PATCH) ** 2
TOKENS = NUM_PATCHES + 1
T_PAD = ((TOKENS + 7) // 8) * 8          # pad token dim to full sublane tiles
PATCH_K = CHANS * PATCH * PATCH
EPS = 1e-6

# Batch elements processed per grid step.  Larger -> fuller MXU M dimension
# (v5e/v6e, single TC).  On v7x pick it so B // BATCH_BLOCK >= 2 and the
# "parallel" batch grid axis shards across the two TensorCores.
BATCH_BLOCK = 2


# ---------------- in-kernel helpers -----------------------------------------
def _layernorm(x, g, b):
    mu = jnp.mean(x, axis=-1, keepdims=True)
    var = jnp.mean(jnp.square(x - mu), axis=-1, keepdims=True)
    return (x - mu) * jax.lax.rsqrt(var + EPS) * g + b


# ---------------- fused Pallas kernel (one transformer block per grid step) --
def fused_vit_kernel(patches_ref, patch_w_ref, patch_b_ref, cls_ref, pos_ref,
                     norm_ref, vecs_ref, bfc1_ref, wqkv_ref, wproj_ref,
                     wfc1_ref, wfc2_ref, out_ref, x_scr):
    d = pl.program_id(1)

    # ---- patch embed + token assembly, once per batch block (d == 0) -------
    @pl.when(d == 0)
    def _():
        pe = jnp.dot(
            patches_ref[...].reshape(BATCH_BLOCK * NUM_PATCHES, PATCH_K)
            .astype(jnp.bfloat16),
            patch_w_ref[...], preferred_element_type=jnp.float32) + patch_b_ref[...]
        pad = jnp.zeros((T_PAD - TOKENS, DIM), jnp.float32)
        rows = []
        for bb in range(BATCH_BLOCK):
            rows.append(cls_ref[...])                              # cls row
            rows.append(pe[bb * NUM_PATCHES:(bb + 1) * NUM_PATCHES])
            rows.append(pad)                                       # pad rows
        x0 = jnp.concatenate(rows, axis=0) + jnp.tile(pos_ref[...], (BATCH_BLOCK, 1))
        x_scr[...] = x0                                            # one dense store

    x = x_scr[...]                                                 # (M, D) f32

    v8 = vecs_ref[...]                                             # (8, D)
    ln1_g, ln1_b = v8[0:1], v8[1:2]
    ln2_g, ln2_b = v8[2:3], v8[3:4]
    bq, bv = v8[4:5], v8[5:6]          # bq already scaled by 1/sqrt(head_dim)
    b_proj, b_fc2 = v8[6:7], v8[7:8]

    # ---- attention: fused QKV matmul, per-head softmax, single projection --
    xn = _layernorm(x, ln1_g, ln1_b).astype(jnp.bfloat16)
    qkv = jnp.dot(xn, wqkv_ref[...], preferred_element_type=jnp.float32)  # (M, 3D)
    q = qkv[:, 0:DIM] + bq
    k = qkv[:, DIM:2 * DIM]            # K bias cancels under softmax -> dropped
    v = qkv[:, 2 * DIM:3 * DIM] + bv

    key_valid = jax.lax.broadcasted_iota(jnp.int32, (1, T_PAD), 1) < TOKENS
    batch_outs = []
    for bb in range(BATCH_BLOCK):
        rs = slice(bb * T_PAD, (bb + 1) * T_PAD)
        head_outs = []
        for h in range(HEADS):
            cs = slice(h * HEAD_DIM, (h + 1) * HEAD_DIM)
            qh = q[rs, cs].astype(jnp.bfloat16)
            kh = k[rs, cs].astype(jnp.bfloat16)
            vh = v[rs, cs].astype(jnp.bfloat16)
            s = jax.lax.dot_general(qh, kh, (((1,), (1,)), ((), ())),
                                    preferred_element_type=jnp.float32)   # (T, T)
            s = jnp.where(key_valid, s, -1e30)          # mask padded key columns
            s = s - jnp.max(s, axis=-1, keepdims=True)
            p = jnp.exp(s)
            p = p * pl.reciprocal(jnp.sum(p, axis=-1, keepdims=True), approx=True)
            head_outs.append(jnp.dot(p.astype(jnp.bfloat16), vh,
                                     preferred_element_type=jnp.float32))
        batch_outs.append(jnp.concatenate(head_outs, axis=-1))             # (T, D)
    attn = jnp.concatenate(batch_outs, axis=0)                             # (M, D)
    x = x + jnp.dot(attn.astype(jnp.bfloat16), wproj_ref[...],
                    preferred_element_type=jnp.float32) + b_proj

    # ---- MLP: x = x + W2(GELU(W1(LN2(x)))) ----------------------------------
    xn2 = _layernorm(x, ln2_g, ln2_b).astype(jnp.bfloat16)
    h1 = jnp.dot(xn2, wfc1_ref[...], preferred_element_type=jnp.float32) + bfc1_ref[...]
    # TODO(synk): DINOv2's Mlp uses exact-erf nn.GELU; tanh-approx GELU is used
    # here (erf has no guaranteed Pallas TPU lowering).
    h1 = jax.nn.gelu(h1)
    h2 = jnp.dot(h1.astype(jnp.bfloat16), wfc2_ref[...],
                 preferred_element_type=jnp.float32) + b_fc2
    x = x + h2

    x_scr[...] = x                               # residual carried across depth

    # ---- emit final-LayerNorm'ed output for each of the last n blocks -------
    @pl.when(d >= DEPTH - N_LAST_BLOCKS)
    def _():
        normed = _layernorm(x, norm_ref[0:1, :], norm_ref[1:2, :])
        idx = d - (DEPTH - N_LAST_BLOCKS)
        out_ref[pl.ds(idx, 1)] = normed.reshape(
            1, BATCH_BLOCK, T_PAD, DIM).astype(out_ref.dtype)


# ---------------- pallas_call wrapper -----------------------------------------
def _const_spec(arr):
    nd = arr.ndim
    return pl.BlockSpec(arr.shape, lambda b, d, nd=nd: (0,) * nd)


def _depth_spec(arr):
    n_rest = arr.ndim - 1
    return pl.BlockSpec((None,) + arr.shape[1:],
                        lambda b, d, n=n_rest: (d,) + (0,) * n)


def fused_forward(patches, params):
    B = patches.shape[0]
    assert B % BATCH_BLOCK == 0
    const_w = (params["patch_w"], params["patch_b"], params["cls_token"],
               params["pos_embed"], params["norm"])
    depth_w = (params["vecs"], params["bfc1"], params["wqkv"],
               params["wproj"], params["wfc1"], params["wfc2"])
    grid_spec = pltpu.PrefetchScalarGridSpec(
        num_scalar_prefetch=0,
        grid=(B // BATCH_BLOCK, DEPTH),                 # depth (carried) last
        in_specs=[pl.BlockSpec((BATCH_BLOCK, NUM_PATCHES, PATCH_K),
                               lambda b, d: (b, 0, 0))]
        + [_const_spec(w) for w in const_w]             # DMA'd once (revisit)
        + [_depth_spec(w) for w in depth_w],            # streamed per block
        out_specs=pl.BlockSpec((N_LAST_BLOCKS, BATCH_BLOCK, T_PAD, DIM),
                               lambda b, d: (0, b, 0, 0)),
        scratch_shapes=[pltpu.VMEM((BATCH_BLOCK * T_PAD, DIM), jnp.float32)],
    )
    return pl.pallas_call(
        fused_vit_kernel,
        out_shape=jax.ShapeDtypeStruct((N_LAST_BLOCKS, B, T_PAD, DIM), jnp.float32),
        grid_spec=grid_spec,
        # Default scoped-VMEM limit is ample at these toy dims; at real DINOv2
        # dims compute weights-in-flight (x2 double buffers) + activations and
        # set vmem_limit_bytes with headroom (< 64 MiB on v7x).
        compiler_params=pltpu.CompilerParams(
            dimension_semantics=("parallel", "arbitrary")),
    )(patches, *const_w, *depth_w)


# ---------------- deterministic parameter init --------------------------------
def init_params(key):
    def nrm(k, shape, s=0.02):
        return (s * jax.random.normal(k, shape)).astype(jnp.float32)

    scale = 1.0 / math.sqrt(HEAD_DIM)
    keys = jax.random.split(key, 3 + 4 * DEPTH)
    ki = iter(keys)

    ones = jnp.ones((DIM,), jnp.float32)
    zeros = jnp.zeros((DIM,), jnp.float32)
    # Per-block small vectors: [ln1_g, ln1_b, ln2_g, ln2_b, bq*scale, bv, b_proj, b_fc2]
    vec_block = jnp.stack([ones, zeros, ones, zeros, zeros, zeros, zeros, zeros])
    vecs = jnp.tile(vec_block[None], (DEPTH, 1, 1))                  # (DEPTH, 8, D)

    wqkv_l, wproj_l, wfc1_l, wfc2_l = [], [], [], []
    for _ in range(DEPTH):
        w = nrm(next(ki), (DIM, 3 * DIM))          # columns: [Q(heads) | K | V]
        w = w.at[:, :DIM].multiply(scale)          # fold 1/sqrt(hd) into Q weight
        wqkv_l.append(w)
        wproj_l.append(nrm(next(ki), (DIM, DIM)))
        wfc1_l.append(nrm(next(ki), (DIM, MLP_DIM)))
        wfc2_l.append(nrm(next(ki), (MLP_DIM, DIM)))

    pos = jnp.zeros((T_PAD, DIM), jnp.float32).at[:TOKENS].set(
        nrm(next(ki), (TOKENS, DIM)))

    params = {
        "patch_w": nrm(next(ki), (PATCH_K, DIM)).astype(jnp.bfloat16),
        "patch_b": jnp.zeros((1, DIM), jnp.float32),
        "cls_token": nrm(next(ki), (1, DIM)),
        "pos_embed": pos,                                            # (T_PAD, D)
        "norm": jnp.stack([ones, zeros]),                            # (2, D)
        "vecs": vecs,                                                # (DEPTH, 8, D)
        "bfc1": jnp.zeros((DEPTH, 1, MLP_DIM), jnp.float32),
        "wqkv": jnp.stack(wqkv_l).astype(jnp.bfloat16),              # (DEPTH, D, 3D)
        "wproj": jnp.stack(wproj_l).astype(jnp.bfloat16),            # (DEPTH, D, D)
        "wfc1": jnp.stack(wfc1_l).astype(jnp.bfloat16),              # (DEPTH, D, MLP)
        "wfc2": jnp.stack(wfc2_l).astype(jnp.bfloat16),              # (DEPTH, MLP, D)
    }
    return params


# ---------------- ModelWithIntermediateLayers.forward -------------------------
def model_with_intermediate_layers(images, params):
    # TODO(synk): torch.inference_mode()/autocast are runtime context managers
    # with no kernel equivalent; eval-mode math, bf16 matmuls + f32 accumulation
    # serve as the autocast analogue.
    B = images.shape[0]
    # NCHW -> patch rows (B, P, C*p*p); flatten order (c, ph, pw) matches
    # torch Conv2d(patch_size, stride=patch_size) weight flattening.
    x = images.reshape(B, CHANS, IMG // PATCH, PATCH, IMG // PATCH, PATCH)
    patches = x.transpose(0, 2, 4, 1, 3, 5).reshape(B, NUM_PATCHES, PATCH_K)

    out = fused_forward(patches, params)            # (n_last, B, T_PAD, D)

    feats = []
    for i in range(N_LAST_BLOCKS):
        normed = out[i]                             # (B, T_PAD, D)
        feats.append((normed[:, 1:TOKENS, :], normed[:, 0, :]))   # (patches, cls)
    return tuple(feats)


# ---------------- main ---------------------------------------------------------
if __name__ == "__main__":
    key = jax.random.PRNGKey(0)
    k_params, k_img = jax.random.split(key)
    params = init_params(k_params)
    images = jax.random.normal(k_img, (2, CHANS, IMG, IMG), dtype=jnp.float32)

    fwd = jax.jit(model_with_intermediate_layers)
    features = jax.block_until_ready(fwd(images, params))

    assert len(features) == N_LAST_BLOCKS
    for patch_tokens, cls_tok in features:
        assert patch_tokens.shape == (2, NUM_PATCHES, DIM)
        assert cls_tok.shape == (2, DIM)
        assert jnp.all(jnp.isfinite(patch_tokens)) and jnp.all(jnp.isfinite(cls_tok))

    print("KERNEL_OK")
</pallas_src>

<mosaic_0001>
module attributes {stable_mosaic.version = 11 : i64} {
  func.func @fused_vit_kernel(%arg0: i32, %arg1: i32, %arg2: memref<2x16x48xf32, #tpu.memory_space<vmem>>, %arg3: memref<48x32xbf16, #tpu.memory_space<vmem>>, %arg4: memref<1x32xf32, #tpu.memory_space<vmem>>, %arg5: memref<1x32xf32, #tpu.memory_space<vmem>>, %arg6: memref<24x32xf32, #tpu.memory_space<vmem>>, %arg7: memref<2x32xf32, #tpu.memory_space<vmem>>, %arg8: memref<1x8x32xf32, #tpu.memory_space<vmem>>, %arg9: memref<1x1x128xf32, #tpu.memory_space<vmem>>, %arg10: memref<1x32x96xbf16, #tpu.memory_space<vmem>>, %arg11: memref<1x32x32xbf16, #tpu.memory_space<vmem>>, %arg12: memref<1x32x128xbf16, #tpu.memory_space<vmem>>, %arg13: memref<1x128x32xbf16, #tpu.memory_space<vmem>>, %arg14: memref<2x2x24x32xf32, #tpu.memory_space<vmem>>, %arg15: memref<48x32xf32, #tpu.memory_space<vmem>>) attributes {dimension_semantics = [#tpu.dimension_semantics<parallel>, #tpu.dimension_semantics<arbitrary>], iteration_bounds = array<i64: 1, 3>, scalar_prefetch = 0 : i64, scratch_operands = 1 : i64, tpu.core_type = #tpu.core_type<tc>, window_params = [{transform_indices = @transform_0, window_bounds = array<i64: 2, 16, 48>}, {pipeline_mode = #tpu.pipeline_mode<synchronous>, transform_indices = @transform_1, window_bounds = array<i64: 48, 32>}, {pipeline_mode = #tpu.pipeline_mode<synchronous>, transform_indices = @transform_2, window_bounds = array<i64: 1, 32>}, {pipeline_mode = #tpu.pipeline_mode<synchronous>, transform_indices = @transform_3, window_bounds = array<i64: 1, 32>}, {pipeline_mode = #tpu.pipeline_mode<synchronous>, transform_indices = @transform_4, window_bounds = array<i64: 24, 32>}, {pipeline_mode = #tpu.pipeline_mode<synchronous>, transform_indices = @transform_5, window_bounds = array<i64: 2, 32>}, {transform_indices = @transform_6, window_bounds = array<i64: 1, 8, 32>}, {transform_indices = @transform_7, window_bounds = array<i64: 1, 1, 128>}, {transform_indices = @transform_8, window_bounds = array<i64: 1, 32, 96>}, {transform_indices = @transform_9, window_bounds = array<i64: 1, 32, 32>}, {transform_indices = @transform_10, window_bounds = array<i64: 1, 32, 128>}, {transform_indices = @transform_11, window_bounds = array<i64: 1, 128, 32>}, {transform_indices = @transform_12, window_bounds = array<i64: 2, 2, 24, 32>}]} {
    %c0_i32 = arith.constant 0 : i32
    %0 = arith.cmpi eq, %arg1, %c0_i32 : i32
    %1 = arith.extui %0 : i1 to i32
    %c0_i32_0 = arith.constant 0 : i32
    %2 = arith.cmpi ne, %1, %c0_i32_0 : i32
    scf.if %2 {
      %c0_60 = arith.constant 0 : index
      %c0_61 = arith.constant 0 : index
      %c0_62 = arith.constant 0 : index
      %206 = vector.load %arg2[%c0_60, %c0_61, %c0_62] : memref<2x16x48xf32, #tpu.memory_space<vmem>>, vector<2x16x48xf32>
      %207 = vector.shape_cast %206 : vector<2x16x48xf32> to vector<32x48xf32>
      %208 = arith.truncf %207 : vector<32x48xf32> to vector<32x48xbf16>
      %c0_63 = arith.constant 0 : index
      %c0_64 = arith.constant 0 : index
      %209 = vector.load %arg3[%c0_63, %c0_64] : memref<48x32xbf16, #tpu.memory_space<vmem>>, vector<48x32xbf16>
      %cst_65 = arith.constant dense<0.000000e+00> : vector<32x32xf32>
      %210 = tpu.matmul %208, %209, %cst_65 {dimension_numbers = #tpu.dot_dimension_numbers<[1], [0], [0], [1], [0, 0, 1, 1], [], []>} : vector<32x48xbf16>, vector<48x32xbf16>, vector<32x32xf32> -> vector<32x32xf32>
      %c0_66 = arith.constant 0 : index
      %c0_67 = arith.constant 0 : index
      %211 = vector.load %arg4[%c0_66, %c0_67] : memref<1x32xf32, #tpu.memory_space<vmem>>, vector<1x32xf32>
      %212 = vector.broadcast %211 : vector<1x32xf32> to vector<32x32xf32>
      %213 = arith.addf %210, %212 : vector<32x32xf32>
      %cst_68 = arith.constant 0.000000e+00 : f32
      %214 = vector.broadcast %cst_68 : f32 to vector<7x32xf32>
      %c0_69 = arith.constant 0 : index
      %c0_70 = arith.constant 0 : index
      %215 = vector.load %arg5[%c0_69, %c0_70] : memref<1x32xf32, #tpu.memory_space<vmem>>, vector<1x32xf32>
      %216 = vector.extract_strided_slice %213 {offsets = [0, 0], sizes = [16, 32], strides = [1, 1]} : vector<32x32xf32> to vector<16x32xf32>
      %c0_71 = arith.constant 0 : index
      %c0_72 = arith.constant 0 : index
      %217 = vector.load %arg5[%c0_71, %c0_72] : memref<1x32xf32, #tpu.memory_space<vmem>>, vector<1x32xf32>
      %218 = vector.extract_strided_slice %213 {offsets = [16, 0], sizes = [16, 32], strides = [1, 1]} : vector<32x32xf32> to vector<16x32xf32>
      %219 = tpu.concatenate %215, %216, %214, %217, %218, %214 in 0 : vector<1x32xf32>, vector<16x32xf32>, vector<7x32xf32>, vector<1x32xf32>, vector<16x32xf32>, vector<7x32xf32> -> vector<48x32xf32>
      %c0_73 = arith.constant 0 : index
      %c0_74 = arith.constant 0 : index
      %220 = vector.load %arg6[%c0_73, %c0_74] : memref<24x32xf32, #tpu.memory_space<vmem>>, vector<24x32xf32>
      %221 = tpu.concatenate %220, %220 in 0 : vector<24x32xf32>, vector<24x32xf32> -> vector<48x32xf32>
      %222 = arith.addf %219, %221 : vector<48x32xf32>
      %c0_75 = arith.constant 0 : index
      %c0_76 = arith.constant 0 : index
      %223 = vector.load %arg15[%c0_75, %c0_76] : memref<48x32xf32, #tpu.memory_space<vmem>>, vector<48x32xf32>
      tpu.vector_store %arg15[%c0_75, %c0_76], %222 {strides = array<i32>} : memref<48x32xf32, #tpu.memory_space<vmem>>, vector<48x32xf32>,
    } else {
    }
    %c0 = arith.constant 0 : index
    %c0_1 = arith.constant 0 : index
    %3 = vector.load %arg15[%c0, %c0_1] : memref<48x32xf32, #tpu.memory_space<vmem>>, vector<48x32xf32>
    %c0_2 = arith.constant 0 : index
    %c0_3 = arith.constant 0 : index
    %c0_4 = arith.constant 0 : index
    %4 = vector.load %arg8[%c0_2, %c0_3, %c0_4] : memref<1x8x32xf32, #tpu.memory_space<vmem>>, vector<1x8x32xf32>
    %5 = vector.shape_cast %4 : vector<1x8x32xf32> to vector<8x32xf32>
    %6 = vector.extract_strided_slice %5 {offsets = [0, 0], sizes = [1, 32], strides = [1, 1]} : vector<8x32xf32> to vector<1x32xf32>
    %7 = vector.extract_strided_slice %5 {offsets = [1, 0], sizes = [1, 32], strides = [1, 1]} : vector<8x32xf32> to vector<1x32xf32>
    %8 = vector.extract_strided_slice %5 {offsets = [2, 0], sizes = [1, 32], strides = [1, 1]} : vector<8x32xf32> to vector<1x32xf32>
    %9 = vector.extract_strided_slice %5 {offsets = [3, 0], sizes = [1, 32], strides = [1, 1]} : vector<8x32xf32> to vector<1x32xf32>
    %10 = vector.extract_strided_slice %5 {offsets = [4, 0], sizes = [1, 32], strides = [1, 1]} : vector<8x32xf32> to vector<1x32xf32>
    %11 = vector.extract_strided_slice %5 {offsets = [5, 0], sizes = [1, 32], strides = [1, 1]} : vector<8x32xf32> to vector<1x32xf32>
    %12 = vector.extract_strided_slice %5 {offsets = [6, 0], sizes = [1, 32], strides = [1, 1]} : vector<8x32xf32> to vector<1x32xf32>
    %13 = vector.extract_strided_slice %5 {offsets = [7, 0], sizes = [1, 32], strides = [1, 1]} : vector<8x32xf32> to vector<1x32xf32>
    %cst = arith.constant dense<0.000000e+00> : vector<48xf32>
    %14 = vector.multi_reduction <add>, %3, %cst [1] : vector<48x32xf32> to vector<48xf32>
    %15 = vector.shape_cast %14 : vector<48xf32> to vector<48x1xf32>
    %cst_5 = arith.constant 3.200000e+01 : f32
    %16 = vector.broadcast %cst_5 : f32 to vector<48x1xf32>
    %17 = arith.divf %15, %16 : vector<48x1xf32>
    %18 = vector.broadcast %17 : vector<48x1xf32> to vector<48x32xf32>
    %19 = arith.subf %3, %18 : vector<48x32xf32>
    %20 = arith.mulf %19, %19 : vector<48x32xf32>
    %cst_6 = arith.constant dense<0.000000e+00> : vector<48xf32>
    %21 = vector.multi_reduction <add>, %20, %cst_6 [1] : vector<48x32xf32> to vector<48xf32>
    %22 = vector.shape_cast %21 : vector<48xf32> to vector<48x1xf32>
    %cst_7 = arith.constant 3.200000e+01 : f32
    %23 = vector.broadcast %cst_7 : f32 to vector<48x1xf32>
    %24 = arith.divf %22, %23 : vector<48x1xf32>
    %25 = vector.broadcast %17 : vector<48x1xf32> to vector<48x32xf32>
    %26 = arith.subf %3, %25 : vector<48x32xf32>
    %cst_8 = arith.constant 9.99999997E-7 : f32
    %27 = vector.broadcast %cst_8 : f32 to vector<48x1xf32>
    %28 = arith.addf %24, %27 : vector<48x1xf32>
    %29 = math.rsqrt %28 : vector<48x1xf32>
    %30 = vector.broadcast %29 : vector<48x1xf32> to vector<48x32xf32>
    %31 = arith.mulf %26, %30 : vector<48x32xf32>
    %32 = vector.broadcast %6 : vector<1x32xf32> to vector<48x32xf32>
    %33 = arith.mulf %31, %32 : vector<48x32xf32>
    %34 = vector.broadcast %7 : vector<1x32xf32> to vector<48x32xf32>
    %35 = arith.addf %33, %34 : vector<48x32xf32>
    %36 = arith.truncf %35 : vector<48x32xf32> to vector<48x32xbf16>
    %c0_9 = arith.constant 0 : index
    %c0_10 = arith.constant 0 : index
    %c0_11 = arith.constant 0 : index
    %37 = vector.load %arg10[%c0_9, %c0_10, %c0_11] : memref<1x32x96xbf16, #tpu.memory_space<vmem>>, vector<1x32x96xbf16>
    %38 = vector.shape_cast %37 : vector<1x32x96xbf16> to vector<32x96xbf16>
    %cst_12 = arith.constant dense<0.000000e+00> : vector<48x96xf32>
    %39 = tpu.matmul %36, %38, %cst_12 {dimension_numbers = #tpu.dot_dimension_numbers<[1], [0], [0], [1], [0, 0, 1, 1], [], []>} : vector<48x32xbf16>, vector<32x96xbf16>, vector<48x96xf32> -> vector<48x96xf32>
    %40 = vector.extract_strided_slice %39 {offsets = [0, 0], sizes = [48, 32], strides = [1, 1]} : vector<48x96xf32> to vector<48x32xf32>
    %41 = vector.broadcast %10 : vector<1x32xf32> to vector<48x32xf32>
    %42 = arith.addf %40, %41 : vector<48x32xf32>
    %43 = vector.extract_strided_slice %39 {offsets = [0, 32], sizes = [48, 32], strides = [1, 1]} : vector<48x96xf32> to vector<48x32xf32>
    %44 = vector.extract_strided_slice %39 {offsets = [0, 64], sizes = [48, 32], strides = [1, 1]} : vector<48x96xf32> to vector<48x32xf32>
    %45 = vector.broadcast %11 : vector<1x32xf32> to vector<48x32xf32>
    %46 = arith.addf %44, %45 : vector<48x32xf32>
    %47 = tpu.iota {dimensions = array<i32: 1>} : vector<1x24xi32>
    %c17_i32 = arith.constant 17 : i32
    %48 = vector.broadcast %c17_i32 : i32 to vector<1x24xi32>
    %49 = arith.cmpi slt, %47, %48 : vector<1x24xi32>
    %50 = vector.extract_strided_slice %42 {offsets = [0, 0], sizes = [24, 16], strides = [1, 1]} : vector<48x32xf32> to vector<24x16xf32>
    %51 = arith.truncf %50 : vector<24x16xf32> to vector<24x16xbf16>
    %52 = vector.extract_strided_slice %43 {offsets = [0, 0], sizes = [24, 16], strides = [1, 1]} : vector<48x32xf32> to vector<24x16xf32>
    %53 = arith.truncf %52 : vector<24x16xf32> to vector<24x16xbf16>
    %54 = vector.extract_strided_slice %46 {offsets = [0, 0], sizes = [24, 16], strides = [1, 1]} : vector<48x32xf32> to vector<24x16xf32>
    %55 = arith.truncf %54 : vector<24x16xf32> to vector<24x16xbf16>
    %cst_13 = arith.constant dense<0.000000e+00> : vector<24x24xf32>
    %56 = tpu.matmul %51, %53, %cst_13 {dimension_numbers = #tpu.dot_dimension_numbers<[1], [1], [0], [0], [0, 0, 1, 0], [], []>} : vector<24x16xbf16>, vector<24x16xbf16>, vector<24x24xf32> -> vector<24x24xf32>
    %cst_14 = arith.constant -1.000000e+30 : f32
    %57 = vector.shape_cast %49 : vector<1x24xi1> to vector<1x24xi1>
    %58 = vector.broadcast %57 : vector<1x24xi1> to vector<24x24xi1>
    %59 = vector.broadcast %cst_14 : f32 to vector<24x24xf32>
    %60 = arith.select %58, %56, %59 : vector<24x24xi1>, vector<24x24xf32>
    %cst_15 = arith.constant dense<0xFF800000> : vector<24xf32>
    %61 = vector.multi_reduction <maximumf>, %60, %cst_15 [1] : vector<24x24xf32> to vector<24xf32>
    %62 = vector.shape_cast %61 : vector<24xf32> to vector<24x1xf32>
    %63 = vector.broadcast %62 : vector<24x1xf32> to vector<24x24xf32>
    %64 = arith.subf %60, %63 : vector<24x24xf32>
    %65 = math.exp %64 : vector<24x24xf32>
    %cst_16 = arith.constant dense<0.000000e+00> : vector<24xf32>
    %66 = vector.multi_reduction <add>, %65, %cst_16 [1] : vector<24x24xf32> to vector<24xf32>
    %67 = vector.shape_cast %66 : vector<24xf32> to vector<24x1xf32>
    %68 = tpu.reciprocal %67 {approx = true} : vector<24x1xf32> -> vector<24x1xf32>
    %69 = vector.broadcast %68 : vector<24x1xf32> to vector<24x24xf32>
    %70 = arith.mulf %65, %69 : vector<24x24xf32>
    %71 = arith.truncf %70 : vector<24x24xf32> to vector<24x24xbf16>
    %cst_17 = arith.constant dense<0.000000e+00> : vector<24x16xf32>
    %72 = tpu.matmul %71, %55, %cst_17 {dimension_numbers = #tpu.dot_dimension_numbers<[1], [0], [0], [1], [0, 0, 1, 1], [], []>} : vector<24x24xbf16>, vector<24x16xbf16>, vector<24x16xf32> -> vector<24x16xf32>
    %73 = vector.extract_strided_slice %42 {offsets = [0, 16], sizes = [24, 16], strides = [1, 1]} : vector<48x32xf32> to vector<24x16xf32>
    %74 = arith.truncf %73 : vector<24x16xf32> to vector<24x16xbf16>
    %75 = vector.extract_strided_slice %43 {offsets = [0, 16], sizes = [24, 16], strides = [1, 1]} : vector<48x32xf32> to vector<24x16xf32>
    %76 = arith.truncf %75 : vector<24x16xf32> to vector<24x16xbf16>
    %77 = vector.extract_strided_slice %46 {offsets = [0, 16], sizes = [24, 16], strides = [1, 1]} : vector<48x32xf32> to vector<24x16xf32>
    %78 = arith.truncf %77 : vector<24x16xf32> to vector<24x16xbf16>
    %cst_18 = arith.constant dense<0.000000e+00> : vector<24x24xf32>
    %79 = tpu.matmul %74, %76, %cst_18 {dimension_numbers = #tpu.dot_dimension_numbers<[1], [1], [0], [0], [0, 0, 1, 0], [], []>} : vector<24x16xbf16>, vector<24x16xbf16>, vector<24x24xf32> -> vector<24x24xf32>
    %cst_19 = arith.constant -1.000000e+30 : f32
    %80 = vector.shape_cast %49 : vector<1x24xi1> to vector<1x24xi1>
    %81 = vector.broadcast %80 : vector<1x24xi1> to vector<24x24xi1>
    %82 = vector.broadcast %cst_19 : f32 to vector<24x24xf32>
    %83 = arith.select %81, %79, %82 : vector<24x24xi1>, vector<24x24xf32>
    %cst_20 = arith.constant dense<0xFF800000> : vector<24xf32>
    %84 = vector.multi_reduction <maximumf>, %83, %cst_20 [1] : vector<24x24xf32> to vector<24xf32>
    %85 = vector.shape_cast %84 : vector<24xf32> to vector<24x1xf32>
    %86 = vector.broadcast %85 : vector<24x1xf32> to vector<24x24xf32>
    %87 = arith.subf %83, %86 : vector<24x24xf32>
    %88 = math.exp %87 : vector<24x24xf32>
    %cst_21 = arith.constant dense<0.000000e+00> : vector<24xf32>
    %89 = vector.multi_reduction <add>, %88, %cst_21 [1] : vector<24x24xf32> to vector<24xf32>
    %90 = vector.shape_cast %89 : vector<24xf32> to vector<24x1xf32>
    %91 = tpu.reciprocal %90 {approx = true} : vector<24x1xf32> -> vector<24x1xf32>
    %92 = vector.broadcast %91 : vector<24x1xf32> to vector<24x24xf32>
    %93 = arith.mulf %88, %92 : vector<24x24xf32>
    %94 = arith.truncf %93 : vector<24x24xf32> to vector<24x24xbf16>
    %cst_22 = arith.constant dense<0.000000e+00> : vector<24x16xf32>
    %95 = tpu.matmul %94, %78, %cst_22 {dimension_numbers = #tpu.dot_dimension_numbers<[1], [0], [0], [1], [0, 0, 1, 1], [], []>} : vector<24x24xbf16>, vector<24x16xbf16>, vector<24x16xf32> -> vector<24x16xf32>
    %96 = tpu.concatenate %72, %95 in 1 : vector<24x16xf32>, vector<24x16xf32> -> vector<24x32xf32>
    %97 = vector.extract_strided_slice %42 {offsets = [24, 0], sizes = [24, 16], strides = [1, 1]} : vector<48x32xf32> to vector<24x16xf32>
    %98 = arith.truncf %97 : vector<24x16xf32> to vector<24x16xbf16>
    %99 = vector.extract_strided_slice %43 {offsets = [24, 0], sizes = [24, 16], strides = [1, 1]} : vector<48x32xf32> to vector<24x16xf32>
    %100 = arith.truncf %99 : vector<24x16xf32> to vector<24x16xbf16>
    %101 = vector.extract_strided_slice %46 {offsets = [24, 0], sizes = [24, 16], strides = [1, 1]} : vector<48x32xf32> to vector<24x16xf32>
    %102 = arith.truncf %101 : vector<24x16xf32> to vector<24x16xbf16>
    %cst_23 = arith.constant dense<0.000000e+00> : vector<24x24xf32>
    %103 = tpu.matmul %98, %100, %cst_23 {dimension_numbers = #tpu.dot_dimension_numbers<[1], [1], [0], [0], [0, 0, 1, 0], [], []>} : vector<24x16xbf16>, vector<24x16xbf16>, vector<24x24xf32> -> vector<24x24xf32>
    %cst_24 = arith.constant -1.000000e+30 : f32
    %104 = vector.shape_cast %49 : vector<1x24xi1> to vector<1x24xi1>
    %105 = vector.broadcast %104 : vector<1x24xi1> to vector<24x24xi1>
    %106 = vector.broadcast %cst_24 : f32 to vector<24x24xf32>
    %107 = arith.select %105, %103, %106 : vector<24x24xi1>, vector<24x24xf32>
    %cst_25 = arith.constant dense<0xFF800000> : vector<24xf32>
    %108 = vector.multi_reduction <maximumf>, %107, %cst_25 [1] : vector<24x24xf32> to vector<24xf32>
    %109 = vector.shape_cast %108 : vector<24xf32> to vector<24x1xf32>
    %110 = vector.broadcast %109 : vector<24x1xf32> to vector<24x24xf32>
    %111 = arith.subf %107, %110 : vector<24x24xf32>
    %112 = math.exp %111 : vector<24x24xf32>
    %cst_26 = arith.constant dense<0.000000e+00> : vector<24xf32>
    %113 = vector.multi_reduction <add>, %112, %cst_26 [1] : vector<24x24xf32> to vector<24xf32>
    %114 = vector.shape_cast %113 : vector<24xf32> to vector<24x1xf32>
    %115 = tpu.reciprocal %114 {approx = true} : vector<24x1xf32> -> vector<24x1xf32>
    %116 = vector.broadcast %115 : vector<24x1xf32> to vector<24x24xf32>
    %117 = arith.mulf %112, %116 : vector<24x24xf32>
    %118 = arith.truncf %117 : vector<24x24xf32> to vector<24x24xbf16>
    %cst_27 = arith.constant dense<0.000000e+00> : vector<24x16xf32>
    %119 = tpu.matmul %118, %102, %cst_27 {dimension_numbers = #tpu.dot_dimension_numbers<[1], [0], [0], [1], [0, 0, 1, 1], [], []>} : vector<24x24xbf16>, vector<24x16xbf16>, vector<24x16xf32> -> vector<24x16xf32>
    %120 = vector.extract_strided_slice %42 {offsets = [24, 16], sizes = [24, 16], strides = [1, 1]} : vector<48x32xf32> to vector<24x16xf32>
    %121 = arith.truncf %120 : vector<24x16xf32> to vector<24x16xbf16>
    %122 = vector.extract_strided_slice %43 {offsets = [24, 16], sizes = [24, 16], strides = [1, 1]} : vector<48x32xf32> to vector<24x16xf32>
    %123 = arith.truncf %122 : vector<24x16xf32> to vector<24x16xbf16>
    %124 = vector.extract_strided_slice %46 {offsets = [24, 16], sizes = [24, 16], strides = [1, 1]} : vector<48x32xf32> to vector<24x16xf32>
    %125 = arith.truncf %124 : vector<24x16xf32> to vector<24x16xbf16>
    %cst_28 = arith.constant dense<0.000000e+00> : vector<24x24xf32>
    %126 = tpu.matmul %121, %123, %cst_28 {dimension_numbers = #tpu.dot_dimension_numbers<[1], [1], [0], [0], [0, 0, 1, 0], [], []>} : vector<24x16xbf16>, vector<24x16xbf16>, vector<24x24xf32> -> vector<24x24xf32>
    %cst_29 = arith.constant -1.000000e+30 : f32
    %127 = vector.shape_cast %49 : vector<1x24xi1> to vector<1x24xi1>
    %128 = vector.broadcast %127 : vector<1x24xi1> to vector<24x24xi1>
    %129 = vector.broadcast %cst_29 : f32 to vector<24x24xf32>
    %130 = arith.select %128, %126, %129 : vector<24x24xi1>, vector<24x24xf32>
    %cst_30 = arith.constant dense<0xFF800000> : vector<24xf32>
    %131 = vector.multi_reduction <maximumf>, %130, %cst_30 [1] : vector<24x24xf32> to vector<24xf32>
    %132 = vector.shape_cast %131 : vector<24xf32> to vector<24x1xf32>
    %133 = vector.broadcast %132 : vector<24x1xf32> to vector<24x24xf32>
    %134 = arith.subf %130, %133 : vector<24x24xf32>
    %135 = math.exp %134 : vector<24x24xf32>
    %cst_31 = arith.constant dense<0.000000e+00> : vector<24xf32>
    %136 = vector.multi_reduction <add>, %135, %cst_31 [1] : vector<24x24xf32> to vector<24xf32>
    %137 = vector.shape_cast %136 : vector<24xf32> to vector<24x1xf32>
    %138 = tpu.reciprocal %137 {approx = true} : vector<24x1xf32> -> vector<24x1xf32>
    %139 = vector.broadcast %138 : vector<24x1xf32> to vector<24x24xf32>
    %140 = arith.mulf %135, %139 : vector<24x24xf32>
    %141 = arith.truncf %140 : vector<24x24xf32> to vector<24x24xbf16>
    %cst_32 = arith.constant dense<0.000000e+00> : vector<24x16xf32>
    %142 = tpu.matmul %141, %125, %cst_32 {dimension_numbers = #tpu.dot_dimension_numbers<[1], [0], [0], [1], [0, 0, 1, 1], [], []>} : vector<24x24xbf16>, vector<24x16xbf16>, vector<24x16xf32> -> vector<24x16xf32>
    %143 = tpu.concatenate %119, %142 in 1 : vector<24x16xf32>, vector<24x16xf32> -> vector<24x32xf32>
    %144 = tpu.concatenate %96, %143 in 0 : vector<24x32xf32>, vector<24x32xf32> -> vector<48x32xf32>
    %145 = arith.truncf %144 : vector<48x32xf32> to vector<48x32xbf16>
    %c0_33 = arith.constant 0 : index
    %c0_34 = arith.constant 0 : index
    %c0_35 = arith.constant 0 : index
    %146 = vector.load %arg11[%c0_33, %c0_34, %c0_35] : memref<1x32x32xbf16, #tpu.memory_space<vmem>>, vector<1x32x32xbf16>
    %147 = vector.shape_cast %146 : vector<1x32x32xbf16> to vector<32x32xbf16>
    %cst_36 = arith.constant dense<0.000000e+00> : vector<48x32xf32>
    %148 = tpu.matmul %145, %147, %cst_36 {dimension_numbers = #tpu.dot_dimension_numbers<[1], [0], [0], [1], [0, 0, 1, 1], [], []>} : vector<48x32xbf16>, vector<32x32xbf16>, vector<48x32xf32> -> vector<48x32xf32>
    %149 = arith.addf %3, %148 : vector<48x32xf32>
    %150 = vector.broadcast %12 : vector<1x32xf32> to vector<48x32xf32>
    %151 = arith.addf %149, %150 : vector<48x32xf32>
    %cst_37 = arith.constant dense<0.000000e+00> : vector<48xf32>
    %152 = vector.multi_reduction <add>, %151, %cst_37 [1] : vector<48x32xf32> to vector<48xf32>
    %153 = vector.shape_cast %152 : vector<48xf32> to vector<48x1xf32>
    %cst_38 = arith.constant 3.200000e+01 : f32
    %154 = vector.broadcast %cst_38 : f32 to vector<48x1xf32>
    %155 = arith.divf %153, %154 : vector<48x1xf32>
    %156 = vector.broadcast %155 : vector<48x1xf32> to vector<48x32xf32>
    %157 = arith.subf %151, %156 : vector<48x32xf32>
    %158 = arith.mulf %157, %157 : vector<48x32xf32>
    %cst_39 = arith.constant dense<0.000000e+00> : vector<48xf32>
    %159 = vector.multi_reduction <add>, %158, %cst_39 [1] : vector<48x32xf32> to vector<48xf32>
    %160 = vector.shape_cast %159 : vector<48xf32> to vector<48x1xf32>
    %cst_40 = arith.constant 3.200000e+01 : f32
    %161 = vector.broadcast %cst_40 : f32 to vector<48x1xf32>
    %162 = arith.divf %160, %161 : vector<48x1xf32>
    %163 = vector.broadcast %155 : vector<48x1xf32> to vector<48x32xf32>
    %164 = arith.subf %151, %163 : vector<48x32xf32>
    %cst_41 = arith.constant 9.99999997E-7 : f32
    %165 = vector.broadcast %cst_41 : f32 to vector<48x1xf32>
    %166 = arith.addf %162, %165 : vector<48x1xf32>
    %167 = math.rsqrt %166 : vector<48x1xf32>
    %168 = vector.broadcast %167 : vector<48x1xf32> to vector<48x32xf32>
    %169 = arith.mulf %164, %168 : vector<48x32xf32>
    %170 = vector.broadcast %8 : vector<1x32xf32> to vector<48x32xf32>
    %171 = arith.mulf %169, %170 : vector<48x32xf32>
    %172 = vector.broadcast %9 : vector<1x32xf32> to vector<48x32xf32>
    %173 = arith.addf %171, %172 : vector<48x32xf32>
    %174 = arith.truncf %173 : vector<48x32xf32> to vector<48x32xbf16>
    %c0_42 = arith.constant 0 : index
    %c0_43 = arith.constant 0 : index
    %c0_44 = arith.constant 0 : index
    %175 = vector.load %arg12[%c0_42, %c0_43, %c0_44] : memref<1x32x128xbf16, #tpu.memory_space<vmem>>, vector<1x32x128xbf16>
    %176 = vector.shape_cast %175 : vector<1x32x128xbf16> to vector<32x128xbf16>
    %cst_45 = arith.constant dense<0.000000e+00> : vector<48x128xf32>
    %177 = tpu.matmul %174, %176, %cst_45 {dimension_numbers = #tpu.dot_dimension_numbers<[1], [0], [0], [1], [0, 0, 1, 1], [], []>} : vector<48x32xbf16>, vector<32x128xbf16>, vector<48x128xf32> -> vector<48x128xf32>
    %c0_46 = arith.constant 0 : index
    %c0_47 = arith.constant 0 : index
    %c0_48 = arith.constant 0 : index
    %178 = vector.load %arg9[%c0_46, %c0_47, %c0_48] : memref<1x1x128xf32, #tpu.memory_space<vmem>>, vector<1x1x128xf32>
    %179 = vector.shape_cast %178 : vector<1x1x128xf32> to vector<1x128xf32>
    %180 = vector.broadcast %179 : vector<1x128xf32> to vector<48x128xf32>
    %181 = arith.addf %177, %180 : vector<48x128xf32>
    %182 = arith.mulf %181, %181 : vector<48x128xf32>
    %183 = arith.mulf %181, %182 : vector<48x128xf32>
    %cst_49 = arith.constant 4.471500e-02 : f32
    %184 = vector.broadcast %cst_49 : f32 to vector<48x128xf32>
    %185 = arith.mulf %184, %183 : vector<48x128xf32>
    %186 = arith.addf %181, %185 : vector<48x128xf32>
    %cst_50 = arith.constant 0.797884583 : f32
    %187 = vector.broadcast %cst_50 : f32 to vector<48x128xf32>
    %188 = arith.mulf %187, %186 : vector<48x128xf32>
    %189 = math.tanh %188 : vector<48x128xf32>
    %cst_51 = arith.constant 1.000000e+00 : f32
    %190 = vector.broadcast %cst_51 : f32 to vector<48x128xf32>
    %191 = arith.addf %190, %189 : vector<48x128xf32>
    %cst_52 = arith.constant 5.000000e-01 : f32
    %192 = vector.broadcast %cst_52 : f32 to vector<48x128xf32>
    %193 = arith.mulf %192, %191 : vector<48x128xf32>
    %194 = arith.mulf %181, %193 : vector<48x128xf32>
    %195 = arith.truncf %194 : vector<48x128xf32> to vector<48x128xbf16>
    %c0_53 = arith.constant 0 : index
    %c0_54 = arith.constant 0 : index
    %c0_55 = arith.constant 0 : index
    %196 = vector.load %arg13[%c0_53, %c0_54, %c0_55] : memref<1x128x32xbf16, #tpu.memory_space<vmem>>, vector<1x128x32xbf16>
    %197 = vector.shape_cast %196 : vector<1x128x32xbf16> to vector<128x32xbf16>
    %cst_56 = arith.constant dense<0.000000e+00> : vector<48x32xf32>
    %198 = tpu.matmul %195, %197, %cst_56 {dimension_numbers = #tpu.dot_dimension_numbers<[1], [0], [0], [1], [0, 0, 1, 1], [], []>} : vector<48x128xbf16>, vector<128x32xbf16>, vector<48x32xf32> -> vector<48x32xf32>
    %199 = vector.broadcast %13 : vector<1x32xf32> to vector<48x32xf32>
    %200 = arith.addf %198, %199 : vector<48x32xf32>
    %201 = arith.addf %151, %200 : vector<48x32xf32>
    %c0_57 = arith.constant 0 : index
    %c0_58 = arith.constant 0 : index
    %202 = vector.load %arg15[%c0_57, %c0_58] : memref<48x32xf32, #tpu.memory_space<vmem>>, vector<48x32xf32>
    tpu.vector_store %arg15[%c0_57, %c0_58], %201 {strides = array<i32>} : memref<48x32xf32, #tpu.memory_space<vmem>>, vector<48x32xf32>,
    %c1_i32 = arith.constant 1 : i32
    %203 = arith.cmpi sge, %arg1, %c1_i32 : i32
    %204 = arith.extui %203 : i1 to i32
    %c0_i32_59 = arith.constant 0 : i32
    %205 = arith.cmpi ne, %204, %c0_i32_59 : i32
    scf.if %205 {
      %c0_60 = arith.constant 0 : index
      %c0_61 = arith.constant 0 : index
      %206 = vector.load %arg7[%c0_60, %c0_61] : memref<2x32xf32, #tpu.memory_space<vmem>>, vector<1x32xf32>
      %c1 = arith.constant 1 : index
      %c0_62 = arith.constant 0 : index
      %207 = vector.load %arg7[%c1, %c0_62] : memref<2x32xf32, #tpu.memory_space<vmem>>, vector<1x32xf32>
      %cst_63 = arith.constant dense<0.000000e+00> : vector<48xf32>
      %208 = vector.multi_reduction <add>, %201, %cst_63 [1] : vector<48x32xf32> to vector<48xf32>
      %209 = vector.shape_cast %208 : vector<48xf32> to vector<48x1xf32>
      %cst_64 = arith.constant 3.200000e+01 : f32
      %210 = vector.broadcast %cst_64 : f32 to vector<48x1xf32>
      %211 = arith.divf %209, %210 : vector<48x1xf32>
      %212 = vector.broadcast %211 : vector<48x1xf32> to vector<48x32xf32>
      %213 = arith.subf %201, %212 : vector<48x32xf32>
      %214 = arith.mulf %213, %213 : vector<48x32xf32>
      %cst_65 = arith.constant dense<0.000000e+00> : vector<48xf32>
      %215 = vector.multi_reduction <add>, %214, %cst_65 [1] : vector<48x32xf32> to vector<48xf32>
      %216 = vector.shape_cast %215 : vector<48xf32> to vector<48x1xf32>
      %cst_66 = arith.constant 3.200000e+01 : f32
      %217 = vector.broadcast %cst_66 : f32 to vector<48x1xf32>
      %218 = arith.divf %216, %217 : vector<48x1xf32>
      %219 = vector.broadcast %211 : vector<48x1xf32> to vector<48x32xf32>
      %220 = arith.subf %201, %219 : vector<48x32xf32>
      %cst_67 = arith.constant 9.99999997E-7 : f32
      %221 = vector.broadcast %cst_67 : f32 to vector<48x1xf32>
      %222 = arith.addf %218, %221 : vector<48x1xf32>
      %223 = math.rsqrt %222 : vector<48x1xf32>
      %224 = vector.broadcast %223 : vector<48x1xf32> to vector<48x32xf32>
      %225 = arith.mulf %220, %224 : vector<48x32xf32>
      %226 = vector.broadcast %206 : vector<1x32xf32> to vector<48x32xf32>
      %227 = arith.mulf %225, %226 : vector<48x32xf32>
      %228 = vector.broadcast %207 : vector<1x32xf32> to vector<48x32xf32>
      %229 = arith.addf %227, %228 : vector<48x32xf32>
      %c1_i32_68 = arith.constant 1 : i32
      %230 = arith.subi %arg1, %c1_i32_68 : i32
      %231 = vector.shape_cast %229 : vector<48x32xf32> to vector<1x2x24x32xf32>
      %232 = arith.index_cast %230 : i32 to index
      %c0_69 = arith.constant 0 : index
      %c0_70 = arith.constant 0 : index
      %c0_71 = arith.constant 0 : index
      %233 = vector.load %arg14[%232, %c0_69, %c0_70, %c0_71] : memref<2x2x24x32xf32, #tpu.memory_space<vmem>>, vector<1x2x24x32xf32>
      tpu.vector_store %arg14[%232, %c0_69, %c0_70, %c0_71], %231 {strides = array<i32>} : memref<2x2x24x32xf32, #tpu.memory_space<vmem>>, vector<1x2x24x32xf32>,
    } else {
    }
    return
  }
  func.func @transform_0(%arg0: i32, %arg1: i32) -> (i32, i32, i32) {
    %c0_i32 = arith.constant 0 : i32
    %c0_i32_0 = arith.constant 0 : i32
    %c0_i32_1 = arith.constant 0 : i32
    return %arg0, %c0_i32, %c0_i32_0 : i32, i32, i32
  }
  func.func @transform_1(%arg0: i32, %arg1: i32) -> (i32, i32) {
    %c0_i32 = arith.constant 0 : i32
    %c0_i32_0 = arith.constant 0 : i32
    %c0_i32_1 = arith.constant 0 : i32
    return %c0_i32, %c0_i32_0 : i32, i32
  }
  func.func @transform_2(%arg0: i32, %arg1: i32) -> (i32, i32) {
    %c0_i32 = arith.constant 0 : i32
    %c0_i32_0 = arith.constant 0 : i32
    %c0_i32_1 = arith.constant 0 : i32
    return %c0_i32, %c0_i32_0 : i32, i32
  }
  func.func @transform_3(%arg0: i32, %arg1: i32) -> (i32, i32) {
    %c0_i32 = arith.constant 0 : i32
    %c0_i32_0 = arith.constant 0 : i32
    %c0_i32_1 = arith.constant 0 : i32
    return %c0_i32, %c0_i32_0 : i32, i32
  }
  func.func @transform_4(%arg0: i32, %arg1: i32) -> (i32, i32) {
    %c0_i32 = arith.constant 0 : i32
    %c0_i32_0 = arith.constant 0 : i32
    %c0_i32_1 = arith.constant 0 : i32
    return %c0_i32, %c0_i32_0 : i32, i32
  }
  func.func @transform_5(%arg0: i32, %arg1: i32) -> (i32, i32) {
    %c0_i32 = arith.constant 0 : i32
    %c0_i32_0 = arith.constant 0 : i32
    %c0_i32_1 = arith.constant 0 : i32
    return %c0_i32, %c0_i32_0 : i32, i32
  }
  func.func @transform_6(%arg0: i32, %arg1: i32) -> (i32, i32, i32) {
    %c0_i32 = arith.constant 0 : i32
    %c0_i32_0 = arith.constant 0 : i32
    %c0_i32_1 = arith.constant 0 : i32
    return %arg1, %c0_i32, %c0_i32_0 : i32, i32, i32
  }
  func.func @transform_7(%arg0: i32, %arg1: i32) -> (i32, i32, i32) {
    %c0_i32 = arith.constant 0 : i32
    %c0_i32_0 = arith.constant 0 : i32
    %c0_i32_1 = arith.constant 0 : i32
    return %arg1, %c0_i32, %c0_i32_0 : i32, i32, i32
  }
  func.func @transform_8(%arg0: i32, %arg1: i32) -> (i32, i32, i32) {
    %c0_i32 = arith.constant 0 : i32
    %c0_i32_0 = arith.constant 0 : i32
    %c0_i32_1 = arith.constant 0 : i32
    return %arg1, %c0_i32, %c0_i32_0 : i32, i32, i32
  }
  func.func @transform_9(%arg0: i32, %arg1: i32) -> (i32, i32, i32) {
    %c0_i32 = arith.constant 0 : i32
    %c0_i32_0 = arith.constant 0 : i32
    %c0_i32_1 = arith.constant 0 : i32
    return %arg1, %c0_i32, %c0_i32_0 : i32, i32, i32
  }
  func.func @transform_10(%arg0: i32, %arg1: i32) -> (i32, i32, i32) {
    %c0_i32 = arith.constant 0 : i32
    %c0_i32_0 = arith.constant 0 : i32
    %c0_i32_1 = arith.constant 0 : i32
    return %arg1, %c0_i32, %c0_i32_0 : i32, i32, i32
  }
  func.func @transform_11(%arg0: i32, %arg1: i32) -> (i32, i32, i32) {
    %c0_i32 = arith.constant 0 : i32
    %c0_i32_0 = arith.constant 0 : i32
    %c0_i32_1 = arith.constant 0 : i32
    return %arg1, %c0_i32, %c0_i32_0 : i32, i32, i32
  }
  func.func @transform_12(%arg0: i32, %arg1: i32) -> (i32, i32, i32, i32) {
    %c0_i32 = arith.constant 0 : i32
    %c0_i32_0 = arith.constant 0 : i32
    %c0_i32_1 = arith.constant 0 : i32
    %c0_i32_2 = arith.constant 0 : i32
    return %c0_i32, %arg0, %c0_i32_0, %c0_i32_1 : i32, i32, i32, i32
  }
}

</mosaic_0001>

<bundles_post_ra>
// kernel: model_with_intermediate_layers.1
= control target key start
LH: loop header
LB: loop body
LE: loop exit
PB: predicated region body
PF: predicated region fallthrough
CT: control target
= control target key end

     0   :  { %s2480_s21 = smov 0   ;;  %s2482_s22 = smov 0   ;;  %s3140_s0 = inlined_call_operand.vmem [shape: f32[2,16,48], index: 0, kind: input, shape index: {}]   ;;  %s3141_s1 = inlined_call_operand.vmem [shape: bf16[48,32], index: 1, kind: input, shape index: {}]   ;;  %s3142_s2 = inlined_call_operand.vmem [shape: f32[1,32], index: 2, kind: input, shape index: {}]   ;;  %s3143_s3 = inlined_call_operand.vmem [shape: f32[1,32], index: 3, kind: input, shape index: {}]   ;;  %s3144_s4 = inlined_call_operand.vmem [shape: f32[24,32], index: 4, kind: input, shape index: {}]   ;;  %s3145_s5 = inlined_call_operand.vmem [shape: f32[2,32], index: 5, kind: input, shape index: {}]   ;;  %s3146_s6 = inlined_call_operand.vmem [shape: f32[3,8,32], index: 6, kind: input, shape index: {}]   ;;  %s3147_s7 = inlined_call_operand.vmem [shape: f32[3,1,128], index: 7, kind: input, shape index: {}]   ;;  %s3148_s8 = inlined_call_operand.vmem [shape: bf16[3,32,96], index: 8, kind: input, shape index: {}]   ;;  %s3149_s9 = inlined_call_operand.vmem [shape: bf16[3,32,32], index: 9, kind: input, shape index: {}]   ;;  %s3150_s10 = inlined_call_operand.vmem [shape: bf16[3,32,128], index: 10, kind: input, shape index: {}]   ;;  %s3151_s11 = inlined_call_operand.vmem [shape: bf16[3,128,32], index: 11, kind: input, shape index: {}]   ;;  %s3152_s12 = inlined_call_operand.vmem [shape: f32[2,2,24,32], index: 12, kind: output, shape index: {}]  }
   0x1   :  { %s2484_s23 = smov 0  }
   0x2 LB: > { %3155 = sst [smem:[#allocation3_spill]] %s2402_s22  ;;  %s31_s24 = sadd.s32 1, %s2402_s22  ;;  %s2406_s23 = sphi %s2484_s23, %s22_s23   ;;  %s2402_s22 = sphi %s2482_s22, %s3160_s22   ;;  %s2398_s21 = sphi %s2480_s21, %s3159_s21  }
   0x3   : > { %3156 = sst [smem:[#allocation4_spill]] %s2406_s23  ;;  %p2093_p0 = scmp.ge.s32.totalorder %s2406_s23, 1 }
   0x4   : > { %p32_p1 = scmp.ge.s32.totalorder %s31_s24, 3  ;;  %p433_p2 = scmp.lt.s32.totalorder %s2406_s23, 4 }
   0x6   : > { %s3162_s24 = smov (%p32_p1, %s31_s24), 0  ;;  %p434_p3 = pnand %p2093_p0, %p433_p2 }
   0x7   : > { %3157 = sst [smem:[#allocation5_spill]] %s3162_s24  ;;  %p511_p4 = scmp.lt.s32.totalorder (!%p434_p3), %s2398_s21, 2 }
   0x8   : > { %437 = sbr.rel (%p434_p3) target bundleno = 2525 (0x9dd), region = 68  ;;  %p2103_p5 = scmp.ne.s32.totalorder (!%p434_p3), %s2398_s21, 0 }
   0xd   : > { %s2502_s25 = scalar_select %p511_p4, %s2398_s21, 2 }
   0xf   : > { %s2094_s26 = sshll.u32 %s2502_s25, 3  ;;  %s517_s29 = scalar_lea.vmem %s3147_s7, %s2502_s25 }
  0x10   : > { %s2512_s14 = scalar_lea.vmem %s3146_s6, %s2094_s26  ;;  %s2205_s15 = sshll.u32 %s2502_s25, 4 }
  0x11   : > { %s2518_s18 = scalar_lea.vmem %s3148_s8, %s2205_s15  ;;  %s2523_s24 = scalar_lea.vmem %s3149_s9, %s2205_s15 }
  0x12   : > { %s2528_s27 = scalar_lea.vmem %s3150_s10, %s2205_s15  ;;  %s2208_s28 = sshll.u32 %s2502_s25, 6 }
  0x13   : > { %s2534_s13 = scalar_lea.vmem %s3151_s11, %s2208_s28  ;;  %549 = sbr.rel (%p2103_p5) target bundleno = 181 (0xb5), region = 72 }
  0x18   : > { %v2211_v0 = vld [vmem:[%s3141_s1 + $0x10] sm:$0xff]  ;;  %v2210_v1 = vld [vmem:[%s3141_s1 + $0x8] sm:$0xff]  ;;  %v2209_v2 = vld [vmem:[%s3141_s1] sm:$0xff]  ;;  %vm584_vm0 = vcmask 392192   ;;  %vm613_vm1 = vcmask 1040384   ;;  %vm641_vm2 = vcmask 261120  }
  0x19   : > { %596 = vmatpush.bf16.msra.mxu0 %v2211_v0  ;;  %2226 = vmatpush.bf16.msra.mxu1 %v2211_v0  ;;  %v550_v3 = vld [vmem:[%s3140_s0] sm:$0xff]  ;;  %v551_v4 = vld [vmem:[%s3140_s0 + $0x8] sm:$0xff]  ;;  %v552_v5 = vld [vmem:[%s3140_s0 + $0x10] sm:$0xff] }
  0x1a   : > { %v553_v6 = vld [vmem:[%s3140_s0 + $0x18] sm:$0xff]  ;;  %v554_v7 = vpack.c.bf16 %v551_v4, %v550_v3  ;;  %v2260_v9 = vld [vmem:[%s3142_s2] ss:$0 sm:$0xff]  ;;  %v633_v27 = vld [vmem:[%s3144_s4 + $0x8] sm:$0xff] }
  0x1b   : > { %v555_v8 = vpack.c.bf16 %v553_v6, %v552_v5  ;;  %v610_v14 = vld [vmem:[%s3143_s3] sm:$0x1]  ;;  %v634_v28 = vld [vmem:[%s3144_s4 + $0x10] sm:$0xff] }
  0x1c   : > { %v632_v16 = vld [vmem:[%s3144_s4] sm:$0xff] }
  0x1d   : > { %597 = vmatpush.bf16.msra.mxu0 %v2210_v1  ;;  %2227 = vmatpush.bf16.msra.mxu1 %v2210_v1 }
  0x21   : > { %598 = vmatpush.bf16.msra.mxu0 %v2209_v2  ;;  %2228 = vmatpush.bf16.msra.mxu1 %v2209_v2 }
  0x24   : > { %2116 = vmatmul.msk.bf16.vlgmr.msra.gmra.mxu0 %vm584_vm0, %v554_v7  ;;  %2117 = vmatmul.msk.bf16.vlgmr.msra.gmra.mxu1 %vm584_vm0, %v555_v8 }
  0xa1   : > { %v600_v10 = vpop.f32.mrf.mxu0  ;;  %v605_v11 = vpop.f32.mrf.mxu1 }
  0xa2   : > { %v601_v12 = vadd.f32 %v2260_v9, %v600_v10  ;;  %v606_v13 = vadd.f32 %v2260_v9, %v605_v11 }
  0xa4   : > { %v614_v15 = vrot.slane %v601_v12, 7  ;;  %v622_v17 = vrot.slane %v606_v13, 7 }
  0xa6   : > { %v628_v18 = vsel %vm613_vm1, %v610_v14, %v614_v15  ;;  %v630_v19 = vsel %vm613_vm1, %v610_v14, %v622_v17 }
  0xa7   : > { %v635_v20 = vadd.f32 %v632_v16, %v628_v18  ;;  %v638_v21 = vadd.f32 %v632_v16, %v630_v19 }
  0xa9   : > { %642 = vst.msk [vmem:[#allocation2] sm:$0xff] %vm641_vm2, %v635_v20  ;;  %v602_v22 = vpop.f32.mrf.mxu0  ;;  %v607_v23 = vpop.f32.mrf.mxu1 }
  0xaa   : > { %645 = vst.msk [vmem:[#allocation2 + $0x18] sm:$0xff] %vm641_vm2, %v638_v21  ;;  %v603_v24 = vadd.f32 %v2260_v9, %v602_v22  ;;  %v608_v25 = vadd.f32 %v2260_v9, %v607_v23 }
  0xac   : > { %v615_v26 = vrot.slane %v603_v24, 7  ;;  %v623_v29 = vrot.slane %v608_v25, 7 }
  0xae   : > { %v616_v30 = vsel %vm613_vm1, %v614_v15, %v615_v26  ;;  %v629_v31 = vsel %vm613_vm1, %v615_v26, 0.0  ;;  %v624_v32 = vsel %vm613_vm1, %v622_v17, %v623_v29  ;;  %v631_v33 = vsel %vm613_vm1, %v623_v29, 0.0 }
  0xaf   : > { %v636_v34 = vadd.f32 %v633_v27, %v616_v30  ;;  %v637_v35 = vadd.f32 %v634_v28, %v629_v31  ;;  %v639_v36 = vadd.f32 %v633_v27, %v624_v32  ;;  %v640_v37 = vadd.f32 %v634_v28, %v631_v33 }
  0xb1   : > { %643 = vst.msk [vmem:[#allocation2 + $0x8] sm:$0xff] %vm641_vm2, %v636_v34 }
  0xb2   : > { %644 = vst.msk [vmem:[#allocation2 + $0x10] sm:$0xff] %vm641_vm2, %v637_v35 }
  0xb3   : > { %646 = vst.msk [vmem:[#allocation2 + $0x20] sm:$0xff] %vm641_vm2, %v639_v36 }
  0xb4   : > { %647 = vst.msk [vmem:[#allocation2 + $0x28] sm:$0xff] %vm641_vm2, %v640_v37 }
  0xb5 PF: > { %vm655_vm3 = vcmask 261120   ;;  %v648_v39 = vld [vmem:[#allocation2] sm:$0xff]  ;;  %v651_v42 = vld [vmem:[#allocation2 + $0x18] sm:$0xff]  ;;  %v2408_v46 = vmov 32.0   ;;  %v2213_v13 = vld [vmem:[%s2518_s18 + $0x8] sm:$0xff]  ;;  %s2410_s22 = smov 80  }
  0xb6   : > { %v656_v41 = vsel %vm655_vm3, %v648_v39, 0.0  ;;  %v665_v44 = vsel %vm655_vm3, %v651_v42, 0.0  ;;  %2277 = vrcp.f32 %v2408_v46  ;;  %843 = vmatpush.bf16.msra.mxu0 %v2213_v13  ;;  %v2212_v17 = vld [vmem:[%s2518_s18] sm:$0xff]  ;;  %s2409_s18 = smov 96   ;;  %s2411_s23 = smov 112  }
  0xb7   : > { %657 = vadd.xlane.f32.xlu0 %v656_v41  ;;  %s2412_s15 = smov 64   ;;  %s2413_s28 = smov 48  }
  0xb8   : > { %v649_v43 = vld [vmem:[#allocation2 + $0x8] sm:$0xff]  ;;  %s2414_s30 = smov 16   ;;  %p2199_p6 = scmp.lt.s32.totalorder %s2398_s21, 1 }
  0xb9   : > { %v650_v38 = vld [vmem:[#allocation2 + $0x10] sm:$0xff]  ;;  %v659_v45 = vsel %vm655_vm3, %v649_v43, 0.0  ;;  %s2200_s25 = sadd.s32 (!%p2199_p6), 4294967295, %s2398_s21 }
  0xba   : > { %v662_v40 = vsel %vm655_vm3, %v650_v38, 0.0  ;;  %v652_v11 = vld [vmem:[#allocation2 + $0x20] sm:$0xff]  ;;  %844 = vmatpush.bf16.msra.mxu0 %v2212_v17  ;;  %s1943_s21 = smul.u32 (!%p2199_p6), 48, %s2200_s25 }
  0xbb   : > { %663 = vadd.xlane.f32.xlu1 %v662_v40  ;;  %v653_v3 = vld [vmem:[#allocation2 + $0x28] sm:$0xff]  ;;  %v668_v12 = vsel %vm655_vm3, %v652_v11, 0.0 }
  0xbc   : > { %v2278_v47 = vpop.eup %2277  ;;  %v671_v7 = vsel %vm655_vm3, %v653_v3, 0.0  ;;  %s3100_s19 = scalar_lea.vmem (!%p2199_p6), %s3152_s12, %s1943_s21 }
  0xbd   : > { %v675_v48 = vmul.f32 32.0, %v2278_v47  ;;  %vm679_vm4 = vweird.f32 %v2278_v47 }
  0xbf   : > { %660 = vadd.xlane.f32.xlu0 %v659_v45  ;;  %v676_v49 = vsub.f32 1.0, %v675_v48 }
  0xc1   : > { %v677_v50 = vmul.f32 %v2278_v47, %v676_v49 }
  0xc3   : > { %666 = vadd.xlane.f32.xlu1 %v665_v44  ;;  %v678_v51 = vadd.f32 %v2278_v47, %v677_v50 }
  0xc5   : > { %v2589_v52 = vsel %vm679_vm4, %v2278_v47, %v678_v51 }
 0x12a   : > { %v658_v54 = vpop.xlane.xlu0 %657 }
 0x12b   : > { %v681_v56 = vmul.f32 %v2589_v52, %v658_v54 }
 0x12d   : > { %v2595_v58 = vsub.f32 %v648_v39, %v681_v56 }
 0x12e   : > { %v664_v53 = vpop.xlane.xlu1 %663 }
 0x12f   : > { %v683_v55 = vmul.f32 %v2589_v52, %v664_v53  ;;  %v693_v60 = vmul.f32 %v2595_v58, %v2595_v58 }
 0x131   : > { %v2593_v57 = vsub.f32 %v650_v38, %v683_v55  ;;  %v699_v62 = vsel %vm655_vm3, %v693_v60, 0.0  ;;  %v2640_v55 = vld [vmem:[%s2512_s14] sm:$0xff] }
 0x132   : > { %700 = vadd.xlane.f32.xlu2 %v699_v62  ;;  %v661_v0 = vpop.xlane.xlu0 %660 }
 0x133   : > { %v695_v59 = vmul.f32 %v2593_v57, %v2593_v57  ;;  %v682_v2 = vmul.f32 %v2589_v52, %v661_v0 }
 0x135   : > { %v705_v61 = vsel %vm655_vm3, %v695_v59, 0.0  ;;  %v2607_v5 = vsub.f32 %v649_v43, %v682_v2 }
 0x136   : > { %v667_v63 = vpop.xlane.xlu1 %666  ;;  %706 = vadd.xlane.f32.xlu0 %v705_v61  ;;  %v2644_v61 = vperm.slane %v2640_v55, 0 }
 0x137   : > { %v684_v1 = vmul.f32 %v2589_v52, %v667_v63  ;;  %v694_v8 = vmul.f32 %v2607_v5, %v2607_v5 }
 0x139   : > { %v2605_v4 = vsub.f32 %v651_v42, %v684_v1  ;;  %v702_v10 = vsel %vm655_vm3, %v694_v8, 0.0 }
 0x13a   : > { %703 = vadd.xlane.f32.xlu2 %v702_v10 }
 0x13b   : > { %v696_v6 = vmul.f32 %v2605_v4, %v2605_v4 }
 0x13d   : > { %v708_v9 = vsel %vm655_vm3, %v696_v6, 0.0  ;;  %v802_v6 = vperm.slane %v2640_v55, 1 }
 0x13e   : > { %709 = vadd.xlane.f32.xlu1 %v708_v9  ;;  %672 = vadd.xlane.f32.xlu0 %v671_v7 }
 0x142   : > { %669 = vadd.xlane.f32.xlu2 %v668_v12 }
 0x1a5   : > { %v701_v14 = vpop.xlane.xlu2 %700 }
 0x1a6   : > { %v717_v16 = vmul.f32 %v701_v14, %v2589_v52 }
 0x1a8   : > { %v723_v18 = vadd.f32 1e-06, %v717_v16 }
 0x1a9   : > { %v707_v15 = vpop.xlane.xlu0 %706 }
 0x1aa   : > { %v719_v19 = vmul.f32 %v707_v15, %v2589_v52  ;;  %2279 = vrsqrt.f32 %v723_v18  ;;  %vm735_vm6 = vweird.f32 %v723_v18 }
 0x1ac   : > { %v2621_v20 = vadd.f32 1e-06, %v719_v19 }
 0x1ad   : > { %v704_v24 = vpop.xlane.xlu2 %703 }
 0x1ae   : > { %v718_v26 = vmul.f32 %v704_v24, %v2589_v52  ;;  %2281 = vrsqrt.f32 %v2621_v20  ;;  %vm755_vm14 = vweird.f32 %v2621_v20 }
 0x1b0   : > { %v2280_v27 = vpop.eup %2279  ;;  %v724_v31 = vadd.f32 1e-06, %v718_v26 }
 0x1b1   : > { %v710_v21 = vpop.xlane.xlu1 %709  ;;  %v673_v22 = vpop.xlane.xlu0 %672  ;;  %v730_v30 = vmul.f32 %v2280_v27, %v723_v18  ;;  %vm736_vm5 = vweird.f32 %v2280_v27 }
 0x1b2   : > { %v720_v23 = vmul.f32 %v710_v21, %v2589_v52  ;;  %v686_v25 = vmul.f32 %v2589_v52, %v673_v22  ;;  %vm737_vm7 = vmor %vm735_vm6, %vm736_vm5  ;;  %vm745_vm9 = vweird.f32 %v724_v31 }
 0x1b3   : > { %v731_v32 = vmul.f32 %v2280_v27, %v730_v30 }
 0x1b4   : > { %v726_v28 = vadd.f32 1e-06, %v720_v23  ;;  %v2626_v29 = vsub.f32 %v653_v3, %v686_v25  ;;  %v2282_v37 = vpop.eup %2281 }
 0x1b5   : > { %v732_v34 = vmul.f32 0.5, %v731_v32  ;;  %v670_v36 = vpop.xlane.xlu2 %669  ;;  %v750_v45 = vmul.f32 %v2282_v37, %v2621_v20  ;;  %vm756_vm15 = vweird.f32 %v2282_v37 }
 0x1b6   : > { %2283 = vrsqrt.f32 %v726_v28  ;;  %v698_v33 = vmul.f32 %v2626_v29, %v2626_v29  ;;  %v685_v39 = vmul.f32 %v2589_v52, %v670_v36  ;;  %vm765_vm11 = vweird.f32 %v726_v28  ;;  %vm757_vm0 = vmor %vm755_vm14, %vm756_vm15 }
 0x1b7   : > { %2285 = vrsqrt.f32 %v724_v31  ;;  %v733_v38 = vsub.f32 1.5, %v732_v34  ;;  %v751_v53 = vmul.f32 %v2282_v37, %v750_v45 }
 0x1b8   : > { %v714_v35 = vsel %vm655_vm3, %v698_v33, 0.0  ;;  %v2633_v43 = vsub.f32 %v652_v11, %v685_v39 }
 0x1b9   : > { %715 = vadd.xlane.f32.xlu2 %v714_v35  ;;  %v734_v44 = vmul.f32 %v2280_v27, %v733_v38  ;;  %v752_v62 = vmul.f32 0.5, %v751_v53 }
 0x1ba   : > { %v697_v47 = vmul.f32 %v2633_v43, %v2633_v43 }
 0x1bb   : > { %v738_v51 = vsel %vm737_vm7, %v2280_v27, %v734_v44  ;;  %v753_v7 = vsub.f32 1.5, %v752_v62 }
 0x1bc   : > { %v2284_v40 = vpop.eup %2283  ;;  %v711_v50 = vsel %vm655_vm3, %v697_v47, 0.0  ;;  %v789_v60 = vmul.f32 %v738_v51, %v2595_v58  ;;  %v861_v51 = vperm.slane %v2640_v55, 4 }
 0x1bd   : > { %v2286_v41 = vpop.eup %2285  ;;  %v760_v42 = vmul.f32 %v2284_v40, %v726_v28  ;;  %712 = vadd.xlane.f32.xlu1 %v711_v50  ;;  %vm766_vm12 = vweird.f32 %v2284_v40  ;;  %v754_v11 = vmul.f32 %v2282_v37, %v753_v7 }
 0x1be   : > { %v740_v46 = vmul.f32 %v2286_v41, %v724_v31  ;;  %vm746_vm8 = vweird.f32 %v2286_v41  ;;  %v796_v3 = vmul.f32 %v2644_v61, %v789_v60  ;;  %vm767_vm13 = vmor %vm765_vm11, %vm766_vm12  ;;  %vm979_vm11 = vcmask 1043456  }
 0x1bf   : > { %v761_v48 = vmul.f32 %v2284_v40, %v760_v42  ;;  %vm747_vm10 = vmor %vm745_vm9, %vm746_vm8  ;;  %vm894_vm8 = vcmask 130048  }
 0x1c0   : > { %v741_v49 = vmul.f32 %v2286_v41, %v740_v46  ;;  %v803_v9 = vadd.f32 %v802_v6, %v796_v3 }
 0x1c1   : > { %v762_v56 = vmul.f32 0.5, %v761_v48 }
 0x1c2   : > { %v742_v54 = vmul.f32 0.5, %v741_v49 }
 0x1c3   : > { %v763_v0 = vsub.f32 1.5, %v762_v56 }
 0x1c4   : > { %v743_v59 = vsub.f32 1.5, %v742_v54 }
 0x1c5   : > { %v764_v8 = vmul.f32 %v2284_v40, %v763_v0 }
 0x1c6   : > { %v744_v63 = vmul.f32 %v2286_v41, %v743_v59 }
 0x1c7   : > { %v768_v13 = vsel %vm767_vm13, %v2284_v40, %v764_v8 }
 0x1c8   : > { %v748_v1 = vsel %vm747_vm10, %v2286_v41, %v744_v63  ;;  %v792_v14 = vmul.f32 %v768_v13, %v2605_v4  ;;  %vm930_vm10 = vcmask 195584  }
 0x1c9   : > { %v790_v2 = vmul.f32 %v748_v1, %v2607_v5  ;;  %v758_v5 = vsel %vm757_vm0, %v2282_v37, %v754_v11 }
 0x1ca   : > { %v791_v15 = vmul.f32 %v758_v5, %v2593_v57  ;;  %v799_v16 = vmul.f32 %v2644_v61, %v792_v14 }
 0x1cb   : > { %v797_v58 = vmul.f32 %v2644_v61, %v790_v2 }
 0x1cc   : > { %v798_v17 = vmul.f32 %v2644_v61, %v791_v15  ;;  %v806_v18 = vadd.f32 %v802_v6, %v799_v16  ;;  %v868_v16 = vperm.slane %v2640_v55, 5 }
 0x1cd   : > { %v804_v10 = vadd.f32 %v802_v6, %v797_v58 }
 0x1ce   : > { %v805_v19 = vadd.f32 %v802_v6, %v798_v17 }
 0x1cf   : > { %v809_v12 = vpack.c.bf16 %v804_v10, %v803_v9 }
 0x1d0   : > { %v810_v21 = vpack.c.bf16 %v806_v18, %v805_v19 }
 0x1d1   : > { %2126 = vmatmul.msk.bf16.vlgmr.msra.gmra.mxu0 %vm655_vm3, %v809_v12 }
 0x1e1   : > { %2127 = vmatmul.msk.bf16.gmra.mxu0 %vm655_vm3, %v810_v21 }
 0x22c   : > { %v716_v20 = vpop.xlane.xlu2 %715 }
 0x22d   : > { %v722_v22 = vmul.f32 %v716_v20, %v2589_v52 }
 0x22f   : > { %v728_v23 = vadd.f32 1e-06, %v722_v22 }
 0x230   : > { %v713_v24 = vpop.xlane.xlu1 %712 }
 0x231   : > { %2287 = vrsqrt.f32 %v728_v23  ;;  %v721_v25 = vmul.f32 %v713_v24, %v2589_v52  ;;  %vm785_vm1 = vweird.f32 %v728_v23 }
 0x233   : > { %v727_v26 = vadd.f32 1e-06, %v721_v25  ;;  %v879_v25 = vlaneseq }
 0x235   : > { %2289 = vrsqrt.f32 %v727_v26  ;;  %vm775_vm6 = vweird.f32 %v727_v26 }
 0x237   : > { %v2288_v4 = vpop.eup %2287 }
 0x238   : > { %v780_v57 = vmul.f32 %v2288_v4, %v728_v23  ;;  %vm786_vm2 = vweird.f32 %v2288_v4 }
 0x239   : > { %vm787_vm4 = vmor %vm785_vm1, %vm786_vm2 }
 0x23a   : > { %v781_v27 = vmul.f32 %v2288_v4, %v780_v57 }
 0x23b   : > { %v2290_v31 = vpop.eup %2289 }
 0x23c   : > { %v782_v28 = vmul.f32 0.5, %v781_v27  ;;  %v770_v33 = vmul.f32 %v2290_v31, %v727_v26  ;;  %vm776_vm5 = vweird.f32 %v2290_v31 }
 0x23d   : > { %vm777_vm7 = vmor %vm775_vm6, %vm776_vm5 }
 0x23e   : > { %v783_v30 = vsub.f32 1.5, %v782_v28  ;;  %v771_v34 = vmul.f32 %v2290_v31, %v770_v33 }
 0x240   : > { %v784_v32 = vmul.f32 %v2288_v4, %v783_v30  ;;  %v772_v36 = vmul.f32 0.5, %v771_v34 }
 0x242   : > { %v788_v35 = vsel %vm787_vm4, %v2288_v4, %v784_v32  ;;  %v773_v37 = vsub.f32 1.5, %v772_v36  ;;  %v2712_v4 = vand.u32 127, %v879_v25 }
 0x243   : > { %v794_v38 = vmul.f32 %v788_v35, %v2626_v29 }
 0x244   : > { %v774_v39 = vmul.f32 %v2290_v31, %v773_v37  ;;  %vm881_vm9 = vcmp.lt.s32.totalorder %v2712_v4, 17 }
 0x245   : > { %v801_v42 = vmul.f32 %v2644_v61, %v794_v38 }
 0x246   : > { %v778_v40 = vsel %vm777_vm7, %v2290_v31, %v774_v39 }
 0x247   : > { %v793_v41 = vmul.f32 %v778_v40, %v2633_v43  ;;  %v808_v47 = vadd.f32 %v802_v6, %v801_v42 }
 0x249   : > { %v800_v45 = vmul.f32 %v2644_v61, %v793_v41 }
 0x24b   : > { %v807_v46 = vadd.f32 %v802_v6, %v800_v45 }
 0x24d   : > { %v811_v48 = vpack.c.bf16 %v808_v47, %v807_v46 }
 0x24e   : > { %v2662_v44 = vpop.f32.mrf.mxu0 }
 0x24f   : > { %2128 = vmatmul.msk.bf16.gmra.mxu0 %vm655_vm3, %v811_v48  ;;  %v862_v54 = vadd.f32 %v861_v51, %v2662_v44 }
 0x256   : > { %v2666_v49 = vpop.f32.mrf.mxu0 }
 0x257   : > { %v884_v29 = vpack.c.bf16 %v2666_v49, %v2662_v44  ;;  %v863_v53 = vadd.f32 %v861_v51, %v2666_v49 }
 0x259   : > { %890 = vrot.lane.b32.xlu1 %v884_v29, %s2409_s18  ;;  %v882_v56 = vpack.c.bf16 %v863_v53, %v862_v54 }
 0x25e   : > { %v2671_v43 = vpop.f32.mrf.mxu0 }
 0x25f   : > { %v885_v50 = vpack.c.bf16 %v2671_v43, %v2671_v43  ;;  %v864_v59 = vadd.f32 %v861_v51, %v2671_v43 }
 0x261   : > { %892 = vrot.lane.b32.xlu0 %v885_v50, %s2409_s18  ;;  %1009 = vrot.lane.b32.xlu2 %v885_v50, %s2410_s22  ;;  %v883_v60 = vpack.c.bf16 %v864_v59, %v864_v59 }
 0x266   : > { %v2683_v63 = vpop.f32.mrf.mxu0 }
 0x267   : > { %v865_v5 = vadd.f32 %v861_v51, %v2683_v63 }
 0x269   : > { %1007 = vrot.lane.b32.xlu0 %v884_v29, %s2410_s22  ;;  %1003 = vrot.lane.b32.xlu2 %v882_v56, %s2411_s23 }
 0x271   : > { %1005 = vrot.lane.b32.xlu0 %v883_v60, %s2411_s23 }
 0x2bb   : > { %v1010_v61 = vpop.permute.xlu2 %1009 }
 0x2bc   : > { %v1021_v62 = vsel %vm894_vm8, %v1010_v61, 0 }
 0x2bd   : > { %1029 = vmatpush.bf16.xpose.msra.mxu3 %v1021_v62 }
 0x2c3   : > { %v1004_v15 = vpop.permute.xlu2 %1003 }
 0x2cb   : > { %v891_v6 = vpop.permute.xlu1 %890 }
 0x2cc   : > { %v2685_v0 = vpop.f32.mrf.mxu0  ;;  %v902_v10 = vsel %vm894_vm8, %v891_v6, 0 }
 0x2cd   : > { %v1128_v1 = vpack.c.bf16 %v2685_v0, %v2683_v63  ;;  %v866_v13 = vadd.f32 %v861_v51, %v2685_v0 }
 0x2cf   : > { %1246 = vrot.lane.b32.xlu2 %v1128_v1, %s2410_s22  ;;  %v1126_v14 = vpack.c.bf16 %v866_v13, %v865_v5 }
 0x2d3   : > { %v893_v2 = vpop.permute.xlu0 %892 }
 0x2d4   : > { %v905_v3 = vsel %vm894_vm8, %v893_v2, 0  ;;  %v2690_v7 = vpop.f32.mrf.mxu0 }
 0x2d5   : > { %913 = vmatpush.bf16.xpose.msra.mxu1 %v905_v3  ;;  %v867_v58 = vadd.f32 %v861_v51, %v2690_v7  ;;  %v1129_v8 = vpack.c.bf16 %v2690_v7, %v2690_v7 }
 0x2d7   : > { %1136 = vrot.lane.b32.xlu0 %v1129_v8, %s2409_s18  ;;  %1248 = vrot.lane.b32.xlu1 %v1129_v8, %s2410_s22  ;;  %v1127_v12 = vpack.c.bf16 %v867_v58, %v867_v58 }
 0x2d9   : > { %1244 = vrot.lane.b32.xlu2 %v1127_v12, %s2411_s23 }
 0x2db   : > { %v1008_v9 = vpop.permute.xlu0 %1007 }
 0x2dc   : > { %v1018_v11 = vsel %vm894_vm8, %v1008_v9, 0 }
 0x2dd   : > { %914 = vmatpush.bf16.xpose.msra.mxu1 %v902_v10  ;;  %1030 = vmatpush.bf16.xpose.msra.mxu3 %v1018_v11 }
 0x2df   : > { %1242 = vrot.lane.b32.xlu1 %v1126_v14, %s2411_s23 }
 0x2e3   : > { %v1006_v17 = vpop.permute.xlu0 %1005 }
 0x2e4   : > { %2129 = vmatmul.msk.bf16.vlgmr.msra.gmra.mxu1 %vm894_vm8, %v882_v56  ;;  %2133 = vmatmul.msk.bf16.vlgmr.msra.gmra.mxu3 %vm894_vm8, %v1004_v15 }
 0x2e7   : > { %1134 = vrot.lane.b32.xlu1 %v1128_v1, %s2409_s18 }
 0x2ef   : > { %870 = vrot.lane.b32.xlu1 %v868_v16, %s2412_s15 }
 0x2f4   : > { %2130 = vmatmul.msk.bf16.gmra.mxu1 %vm894_vm8, %v883_v60  ;;  %2134 = vmatmul.msk.bf16.gmra.mxu3 %vm894_vm8, %v1006_v17 }
 0x329   : > { %v1247_v22 = vpop.permute.xlu2 %1246 }
 0x32a   : > { %v1257_v24 = vsel %vm894_vm8, %v1247_v22, 0 }
 0x333   : > { %v1245_v35 = vpop.permute.xlu2 %1244 }
 0x349   : > { %v1249_v18 = vpop.permute.xlu1 %1248  ;;  %v1137_v19 = vpop.permute.xlu0 %1136 }
 0x34a   : > { %v1148_v21 = vsel %vm894_vm8, %v1137_v19, 0  ;;  %v1260_v20 = vsel %vm894_vm8, %v1249_v18, 0 }
 0x34b   : > { %1156 = vmatpush.bf16.xpose.msrb.mxu1 %v1148_v21  ;;  %1268 = vmatpush.bf16.xpose.msrb.mxu0 %v1260_v20 }
 0x351   : > { %v1243_v23 = vpop.permute.xlu1 %1242 }
 0x353   : > { %1269 = vmatpush.bf16.xpose.msrb.mxu0 %v1257_v24 }
 0x359   : > { %v1135_v26 = vpop.permute.xlu1 %1134 }
 0x35a   : > { %2141 = vmatmul.msk.bf16.vlgmr.msrb.gmra.mxu0 %vm894_vm8, %v1243_v23  ;;  %v1145_v57 = vsel %vm894_vm8, %v1135_v26, 0 }
 0x35b   : > { %1157 = vmatpush.bf16.xpose.msrb.mxu1 %v1145_v57 }
 0x361   : > { %v916_v27 = vpop.f32.mrf.mxu1  ;;  %v2724_v36 = vpop.permute.xlu1 %870 }
 0x362   : > { %v927_v28 = vsel %vm881_vm9, %v916_v27, -1e+30  ;;  %2137 = vmatmul.msk.bf16.vlgmr.msrb.gmra.mxu1 %vm894_vm8, %v1126_v14  ;;  %v875_v40 = vadd.f32 %v2724_v36, %v2671_v43  ;;  %v873_v47 = vadd.f32 %v2724_v36, %v2662_v44  ;;  %v874_v48 = vadd.f32 %v2724_v36, %v2666_v49 }
 0x363   : > { %v931_v30 = vsel %vm930_vm10, %v927_v28, -inf }
 0x364   : > { %932 = vmax.xlane.f32.xlu0 %v931_v30  ;;  %v2732_v42 = vpack.c.bf16 %v875_v40, %v875_v40  ;;  %v886_v43 = vpack.c.bf16 %v874_v48, %v873_v47 }
 0x367   : > { %v1032_v31 = vpop.f32.mrf.mxu3 }
 0x368   : > { %v1041_v50 = vsel %vm881_vm9, %v1032_v31, -1e+30 }
 0x369   : > { %v918_v32 = vpop.f32.mrf.mxu1  ;;  %v1044_v51 = vsel %vm930_vm10, %v1041_v50, -inf }
 0x36a   : > { %v928_v33 = vsel %vm881_vm9, %v918_v32, -1e+30  ;;  %2142 = vmatmul.msk.bf16.gmra.mxu0 %vm894_vm8, %v1245_v35 }
 0x36b   : > { %v934_v34 = vsel %vm930_vm10, %v928_v33, -inf }
 0x36c   : > { %935 = vmax.xlane.f32.xlu2 %v934_v34 }
 0x36f   : > { %v1034_v37 = vpop.f32.mrf.mxu3 }
 0x370   : > { %v2751_v44 = vsel %vm881_vm9, %v1034_v37, -1e+30 }
 0x371   : > { %v921_v38 = vpop.f32.mrf.mxu1  ;;  %v1047_v54 = vsel %vm930_vm10, %v2751_v44, -inf }
 0x372   : > { %v929_v39 = vsel %vm881_vm9, %v921_v38, -1e+30  ;;  %2138 = vmatmul.msk.bf16.gmra.mxu1 %vm894_vm8, %v1127_v12 }
 0x373   : > { %v937_v41 = vsel %vm930_vm10, %v929_v39, -inf }
 0x374   : > { %938 = vmax.xlane.f32.xlu1 %v937_v41 }
 0x377   : > { %v1037_v45 = vpop.f32.mrf.mxu3 }
 0x378   : > { %970 = vrot.lane.b32.xlu0 %v2732_v42, %s2412_s15  ;;  %v2747_v53 = vsel %vm881_vm9, %v1037_v45, -1e+30 }
 0x379   : > { %v923_v46 = vpop.f32.mrf.mxu1  ;;  %v1050_v49 = vsel %vm930_vm10, %v2747_v53, -inf }
 0x37f   : > { %v1039_v29 = vpop.f32.mrf.mxu3 }
 0x384   : > { %968 = vrot.lane.b32.xlu2 %v886_v43, %s2412_s15 }
 0x3a2   : > { %1045 = vmax.xlane.f32.xlu0 %v1044_v51 }
 0x3aa   : > { %1051 = vmax.xlane.f32.xlu0 %v1050_v49  ;;  %v876_v49 = vadd.f32 %v2724_v36, %v2683_v63 }
 0x3ad   : > { %1048 = vmax.xlane.f32.xlu2 %v1047_v54  ;;  %v877_v54 = vadd.f32 %v2724_v36, %v2685_v0 }
 0x3d7   : > { %v933_v56 = vpop.xlane.xlu0 %932  ;;  %v1271_v61 = vpop.f32.mrf.mxu0 }
 0x3d8   : > { %v940_v59 = vsub.f32 %v927_v28, %v933_v56  ;;  %v2759_v62 = vsel %vm881_vm9, %v1271_v61, -1e+30  ;;  %v1130_v56 = vpack.c.bf16 %v877_v54, %v876_v49 }
 0x3d9   : > { %v1283_v1 = vsel %vm930_vm10, %v2759_v62, -inf }
 0x3da   : > { %v943_v60 = vmul.f32 1.442695, %v940_v59  ;;  %1284 = vmax.xlane.f32.xlu1 %v1283_v1 }
 0x3dc   : > { %2291 = vpow2.f32 %v943_v60 }
 0x3df   : > { %v936_v3 = vpop.xlane.xlu2 %935  ;;  %v1159_v58 = vpop.f32.mrf.mxu1 }
 0x3e0   : > { %v1273_v8 = vpop.f32.mrf.mxu0  ;;  %v941_v9 = vsub.f32 %v928_v33, %v936_v3  ;;  %v2797_v35 = vsel %vm881_vm9, %v1159_v58, -1e+30 }
 0x3e1   : > { %v2769_v10 = vsel %vm881_vm9, %v1273_v8, -1e+30  ;;  %v1171_v38 = vsel %vm930_vm10, %v2797_v35, -inf }
 0x3e2   : > { %v2763_v2 = vpop.eup %2291  ;;  %v1286_v11 = vsel %vm930_vm10, %v2769_v10, -inf  ;;  %v945_v5 = vmul.f32 1.442695, %v941_v9 }
 0x3e3   : > { %v949_v6 = vsel %vm930_vm10, %v2763_v2, 0.0  ;;  %1287 = vmax.xlane.f32.xlu1 %v1286_v11 }
 0x3e4   : > { %950 = vadd.xlane.f32.xlu2 %v949_v6 }
 0x3e7   : > { %v939_v12 = vpop.xlane.xlu1 %938  ;;  %v1161_v17 = vpop.f32.mrf.mxu1 }
 0x3e8   : > { %v942_v13 = vsub.f32 %v929_v39, %v939_v12  ;;  %v1276_v18 = vpop.f32.mrf.mxu0  ;;  %v969_v20 = vpop.permute.xlu2 %968  ;;  %v2804_v41 = vsel %vm881_vm9, %v1161_v17, -1e+30  ;;  %v878_v17 = vadd.f32 %v2724_v36, %v2690_v7 }
 0x3e9   : > { %v2776_v19 = vsel %vm881_vm9, %v1276_v18, -1e+30  ;;  %v1174_v45 = vsel %vm930_vm10, %v2804_v41, -inf }
 0x3ea   : > { %v947_v14 = vmul.f32 1.442695, %v942_v13  ;;  %v971_v15 = vpop.permute.xlu0 %970  ;;  %v1289_v21 = vsel %vm930_vm10, %v2776_v19, -inf }
 0x3eb   : > { %v981_v16 = vsel %vm979_vm11, %v971_v15, 0  ;;  %1290 = vmax.xlane.f32.xlu1 %v1289_v21 }
 0x3ec   : > { %2293 = vpow2.f32 %v947_v14  ;;  %989 = vmatpush.bf16.msra.mxu2 %v981_v16 }
 0x3ed   : > { %2295 = vpow2.f32 %v945_v5 }
 0x3ef   : > { %v1164_v26 = vpop.f32.mrf.mxu1 }
 0x3f0   : > { %990 = vmatpush.bf16.msra.mxu2 %v969_v20  ;;  %v1278_v25 = vpop.f32.mrf.mxu0  ;;  %v2813_v48 = vsel %vm881_vm9, %v1164_v26, -1e+30 }
 0x3f2   : > { %v2780_v22 = vpop.eup %2293 }
 0x3f3   : > { %v2782_v23 = vpop.eup %2295  ;;  %v955_v24 = vsel %vm930_vm10, %v2780_v22, 0.0 }
 0x3f4   : > { %956 = vadd.xlane.f32.xlu0 %v955_v24  ;;  %v952_v57 = vsel %vm930_vm10, %v2782_v23, 0.0 }
 0x3f5   : > { %953 = vadd.xlane.f32.xlu1 %v952_v57 }
 0x3f7   : > { %v1166_v27 = vpop.f32.mrf.mxu1 }
 0x408   : > { %1079 = vrot.lane.b32.xlu0 %v886_v43, %s2413_s28  ;;  %v1177_v43 = vsel %vm930_vm10, %v2813_v48, -inf }
 0x40e   : > { %1081 = vrot.lane.b32.xlu1 %v2732_v42, %s2413_s28 }
 0x415   : > { %v1046_v28 = vpop.xlane.xlu0 %1045 }
 0x416   : > { %v1053_v30 = vsub.f32 %v1041_v50, %v1046_v28 }
 0x418   : > { %v1056_v31 = vmul.f32 1.442695, %v1053_v30 }
 0x41a   : > { %2297 = vpow2.f32 %v1056_v31 }
 0x41d   : > { %v1052_v40 = vpop.xlane.xlu0 %1051 }
 0x41e   : > { %v1055_v42 = vsub.f32 %v2747_v53, %v1052_v40 }
 0x420   : > { %v2791_v32 = vpop.eup %2297  ;;  %v1049_v34 = vpop.xlane.xlu2 %1048  ;;  %v1060_v46 = vmul.f32 1.442695, %v1055_v42 }
 0x421   : > { %v1062_v33 = vsel %vm930_vm10, %v2791_v32, 0.0  ;;  %v1054_v37 = vsub.f32 %v2751_v44, %v1049_v34 }
 0x422   : > { %1063 = vadd.xlane.f32.xlu2 %v1062_v33 }
 0x423   : > { %v1058_v39 = vmul.f32 1.442695, %v1054_v37 }
 0x425   : > { %2299 = vpow2.f32 %v1058_v39 }
 0x426   : > { %2301 = vpow2.f32 %v1060_v46 }
 0x42a   : > { %1172 = vmax.xlane.f32.xlu2 %v1171_v38 }
 0x42b   : > { %v2809_v47 = vpop.eup %2299 }
 0x42c   : > { %v1065_v29 = vsel %vm930_vm10, %v2809_v47, 0.0  ;;  %v2819_v50 = vpop.eup %2301 }
 0x42d   : > { %v1068_v51 = vsel %vm930_vm10, %v2819_v50, 0.0 }
 0x432   : > { %1175 = vmax.xlane.f32.xlu2 %v1174_v45 }
 0x438   : > { %1066 = vadd.xlane.f32.xlu1 %v1065_v29 }
 0x43a   : > { %1178 = vmax.xlane.f32.xlu2 %v1177_v43 }
 0x440   : > { %1069 = vadd.xlane.f32.xlu1 %v1068_v51 }
 0x44d   : > { %v1285_v53 = vpop.xlane.xlu1 %1284 }
 0x44e   : > { %v1292_v4 = vsub.f32 %v2759_v62, %v1285_v53 }
 0x450   : > { %v1295_v44 = vmul.f32 1.442695, %v1292_v4 }
 0x452   : > { %2303 = vpow2.f32 %v1295_v44 }
 0x456   : > { %v1288_v59 = vpop.xlane.xlu1 %1287 }
 0x457   : > { %v1293_v60 = vsub.f32 %v2769_v10, %v1288_v59  ;;  %v951_v58 = vpop.xlane.xlu2 %950 }
 0x458   : > { %v2830_v61 = vpop.eup %2303 }
 0x459   : > { %1318 = vrot.lane.b32.xlu1 %v1130_v56, %s2413_s28  ;;  %v1297_v1 = vmul.f32 1.442695, %v1293_v60  ;;  %v1301_v62 = vsel %vm930_vm10, %v2830_v61, 0.0 }
 0x45a   : > { %1302 = vadd.xlane.f32.xlu0 %v1301_v62 }
 0x45b   : > { %2305 = vpow2.f32 %v1297_v1 }
 0x45e   : > { %v1291_v3 = vpop.xlane.xlu1 %1290 }
 0x45f   : > { %v1294_v63 = vsub.f32 %v2776_v19, %v1291_v3  ;;  %v1131_v19 = vpack.c.bf16 %v878_v17, %v878_v17 }
 0x461   : > { %v2835_v6 = vpop.eup %2305  ;;  %v1299_v0 = vmul.f32 1.442695, %v1294_v63 }
 0x462   : > { %v1304_v8 = vsel %vm930_vm10, %v2835_v6, 0.0 }
 0x463   : > { %2307 = vpow2.f32 %v1299_v0  ;;  %1305 = vadd.xlane.f32.xlu2 %v1304_v8 }
 0x464   : > { %2309 = vrcp.f32 %v951_v58 }
 0x467   : > { %v957_v15 = vpop.xlane.xlu0 %956 }
 0x468   : > { %v954_v9 = vpop.xlane.xlu1 %953 }
 0x469   : > { %2311 = vrcp.f32 %v954_v9  ;;  %v2839_v10 = vpop.eup %2307 }
 0x46a   : > { %v1307_v11 = vsel %vm930_vm10, %v2839_v10, 0.0  ;;  %v2310_v12 = vpop.eup %2309  ;;  %2313 = vrcp.f32 %v957_v15 }
 0x46b   : > { %1308 = vadd.xlane.f32.xlu0 %v1307_v11  ;;  %v961_v5 = vmul.f32 %v2310_v12, %v2763_v2 }
 0x46f   : > { %v2312_v13 = vpop.eup %2311 }
 0x470   : > { %v962_v14 = vmul.f32 %v2312_v13, %v2782_v23  ;;  %v2314_v18 = vpop.eup %2313 }
 0x471   : > { %v963_v21 = vmul.f32 %v2314_v18, %v2780_v22 }
 0x472   : > { %v964_v16 = vpack.c.bf16 %v962_v14, %v961_v5 }
 0x473   : > { %v965_v23 = vpack.c.bf16 %v963_v21, %v963_v21 }
 0x474   : > { %2131 = vmatmul.msk.bf16.vlgmr.msra.gmra.mxu2 %vm930_vm10, %v964_v16 }
 0x47a   : > { %v1080_v24 = vpop.permute.xlu0 %1079 }
 0x47b   : > { %1320 = vrot.lane.b32.xlu2 %v1131_v19, %s2413_s28 }
 0x47f   : > { %1210 = vrot.lane.b32.xlu0 %v1131_v19, %s2412_s15 }
 0x480   : > { %v1082_v20 = vpop.permute.xlu1 %1081 }
 0x481   : > { %v1091_v2 = vsel %vm979_vm11, %v1082_v20, 0 }
 0x482   : > { %1099 = vmatpush.bf16.msrb.mxu2 %v1091_v2 }
 0x484   : > { %2132 = vmatmul.msk.bf16.gmra.mxu2 %vm930_vm10, %v965_v23 }
 0x486   : > { %1100 = vmatpush.bf16.msrb.mxu2 %v1080_v24 }
 0x487   : > { %1208 = vrot.lane.b32.xlu0 %v1130_v56, %s2412_s15 }
 0x495   : > { %v1064_v7 = vpop.xlane.xlu2 %1063 }
 0x49d   : > { %v1173_v36 = vpop.xlane.xlu2 %1172 }
 0x49e   : > { %v1180_v25 = vsub.f32 %v2797_v35, %v1173_v36  ;;  %v2215_v36 = vld [vmem:[%s2523_s24 + $0x8] sm:$0xff] }
 0x49f   : > { %1399 = vmatpush.bf16.msra.mxu1 %v2215_v36 }
 0x4a0   : > { %v1183_v26 = vmul.f32 1.442695, %v1180_v25 }
 0x4a2   : > { %2315 = vpow2.f32 %v1183_v26 }
 0x4a5   : > { %v1176_v22 = vpop.xlane.xlu2 %1175 }
 0x4a6   : > { %v1181_v57 = vsub.f32 %v2804_v41, %v1176_v22 }
 0x4a8   : > { %v2856_v27 = vpop.eup %2315  ;;  %v1185_v28 = vmul.f32 1.442695, %v1181_v57 }
 0x4a9   : > { %v1189_v30 = vsel %vm930_vm10, %v2856_v27, 0.0 }
 0x4aa   : > { %2317 = vpow2.f32 %v1185_v28  ;;  %1190 = vadd.xlane.f32.xlu2 %v1189_v30  ;;  %v2214_v28 = vld [vmem:[%s2523_s24] sm:$0xff] }
 0x4ab   : > { %2319 = vrcp.f32 %v1064_v7  ;;  %v1067_v31 = vpop.xlane.xlu1 %1066  ;;  %1400 = vmatpush.bf16.msra.mxu1 %v2214_v28 }
 0x4ac   : > { %2321 = vrcp.f32 %v1067_v31 }
 0x4ad   : > { %v1179_v33 = vpop.xlane.xlu2 %1178 }
 0x4ae   : > { %v1182_v34 = vsub.f32 %v2813_v48, %v1179_v33 }
 0x4b0   : > { %v2318_v35 = vpop.eup %2317  ;;  %v1187_v37 = vmul.f32 1.442695, %v1182_v34 }
 0x4b1   : > { %v1192_v38 = vsel %vm930_vm10, %v2318_v35, 0.0  ;;  %v2320_v39 = vpop.eup %2319 }
 0x4b2   : > { %2323 = vpow2.f32 %v1187_v37  ;;  %1193 = vadd.xlane.f32.xlu1 %v1192_v38  ;;  %v2322_v40 = vpop.eup %2321  ;;  %v1074_v41 = vmul.f32 %v2320_v39, %v2791_v32 }
 0x4b3   : > { %v1075_v42 = vmul.f32 %v2322_v40, %v2809_v47  ;;  %v1070_v45 = vpop.xlane.xlu1 %1069 }
 0x4b4   : > { %2325 = vrcp.f32 %v1070_v45 }
 0x4b5   : > { %v1077_v46 = vpack.c.bf16 %v1075_v42, %v1074_v41 }
 0x4b7   : > { %2135 = vmatmul.msk.bf16.vlgmr.msrb.gmra.mxu2 %vm930_vm10, %v1077_v46 }
 0x4b8   : > { %v2324_v29 = vpop.eup %2323 }
 0x4b9   : > { %v1195_v43 = vsel %vm930_vm10, %v2324_v29, 0.0 }
 0x4ba   : > { %1196 = vadd.xlane.f32.xlu0 %v1195_v43  ;;  %v2326_v48 = vpop.eup %2325 }
 0x4bb   : > { %v1076_v51 = vmul.f32 %v2326_v48, %v2819_v50 }
 0x4bd   : > { %v1078_v53 = vpack.c.bf16 %v1076_v51, %v1076_v51 }
 0x4c7   : > { %2136 = vmatmul.msk.bf16.gmra.mxu2 %vm930_vm10, %v1078_v53 }
 0x4cb   : > { %v1319_v59 = vpop.permute.xlu1 %1318 }
 0x4cd   : > { %v1303_v44 = vpop.xlane.xlu0 %1302 }
 0x4d6   : > { %v1306_v4 = vpop.xlane.xlu2 %1305 }
 0x4d7   : > { %2327 = vrcp.f32 %v1306_v4 }
 0x4d8   : > { %2329 = vrcp.f32 %v1303_v44 }
 0x4dd   : > { %v2328_v32 = vpop.eup %2327 }
 0x4de   : > { %v1321_v47 = vpop.permute.xlu2 %1320  ;;  %v2330_v54 = vpop.eup %2329  ;;  %v1314_v56 = vmul.f32 %v2328_v32, %v2835_v6 }
 0x4df   : > { %v1330_v49 = vsel %vm979_vm11, %v1321_v47, 0  ;;  %v1313_v60 = vmul.f32 %v2330_v54, %v2830_v61  ;;  %v1309_v1 = vpop.xlane.xlu0 %1308  ;;  %v1423_v54 = vperm.slane %v2640_v55, 6  ;;  %v2365_v55 = vld [vmem:[#allocation2 + $0x10] sm:$0xff] }
 0x4e0   : > { %1338 = vmatpush.bf16.msra.mxu2 %v1330_v49  ;;  %2331 = vrcp.f32 %v1309_v1 }
 0x4e1   : > { %v1316_v50 = vpack.c.bf16 %v1314_v56, %v1313_v60 }
 0x4e4   : > { %1339 = vmatpush.bf16.msra.mxu2 %v1319_v59  ;;  %v2363_v59 = vld [vmem:[#allocation2] sm:$0xff] }
 0x4e6   : > { %v2332_v62 = vpop.eup %2331 }
 0x4e7   : > { %2143 = vmatmul.msk.bf16.vlgmr.msra.gmra.mxu2 %vm930_vm10, %v1316_v50  ;;  %v1315_v63 = vmul.f32 %v2332_v62, %v2839_v10 }
 0x4e9   : > { %v1317_v8 = vpack.c.bf16 %v1315_v63, %v1315_v63 }
 0x4f1   : > { %v1211_v3 = vpop.permute.xlu0 %1210 }
 0x4f2   : > { %v1220_v0 = vsel %vm979_vm11, %v1211_v3, 0  ;;  %v2364_v3 = vld [vmem:[#allocation2 + $0x8] sm:$0xff] }
 0x4f3   : > { %1228 = vmatpush.bf16.msrb.mxu3 %v1220_v0 }
 0x4f7   : > { %v992_v58 = vpop.f32.mrf.mxu2  ;;  %2144 = vmatmul.msk.bf16.gmra.mxu2 %vm930_vm10, %v1317_v8 }
 0x4f9   : > { %v1209_v6 = vpop.permute.xlu0 %1208 }
 0x4fa   : > { %1229 = vmatpush.bf16.msrb.mxu3 %v1209_v6 }
 0x4ff   : > { %v994_v61 = vpop.f32.mrf.mxu2 }
 0x507   : > { %v997_v9 = vpop.f32.mrf.mxu2 }
 0x50f   : > { %v999_v11 = vpop.f32.mrf.mxu2 }
 0x51d   : > { %v1191_v12 = vpop.xlane.xlu2 %1190 }
 0x51e   : > { %2333 = vrcp.f32 %v1191_v12  ;;  %v2366_v12 = vld [vmem:[#allocation2 + $0x18] sm:$0xff] }
 0x524   : > { %v2334_v5 = vpop.eup %2333 }
 0x525   : > { %v1194_v13 = vpop.xlane.xlu1 %1193  ;;  %v1201_v10 = vmul.f32 %v2334_v5, %v2856_v27 }
 0x526   : > { %2335 = vrcp.f32 %v1194_v13 }
 0x52c   : > { %v2336_v14 = vpop.eup %2335 }
 0x52d   : > { %v1202_v15 = vmul.f32 %v2336_v14, %v2318_v35  ;;  %v1197_v16 = vpop.xlane.xlu0 %1196 }
 0x52e   : > { %2337 = vrcp.f32 %v1197_v16 }
 0x52f   : > { %v1204_v17 = vpack.c.bf16 %v1202_v15, %v1201_v10  ;;  %v2367_v15 = vld [vmem:[#allocation2 + $0x20] sm:$0xff] }
 0x531   : > { %2139 = vmatmul.msk.bf16.vlgmr.msrb.gmra.mxu3 %vm930_vm10, %v1204_v17 }
 0x534   : > { %v2338_v18 = vpop.eup %2337 }
 0x535   : > { %v1203_v19 = vmul.f32 %v2338_v18, %v2324_v29 }
 0x537   : > { %v1205_v20 = vpack.c.bf16 %v1203_v19, %v1203_v19 }
 0x53a   : > { %v1102_v21 = vpop.f32.mrf.mxu2 }
 0x541   : > { %2140 = vmatmul.msk.bf16.gmra.mxu3 %vm930_vm10, %v1205_v20 }
 0x542   : > { %v1104_v2 = vpop.f32.mrf.mxu2 }
 0x543   : > { %v2261_v23 = vpack.i.bf16 %v1104_v2, %v1102_v21  ;;  %v2368_v21 = vld [vmem:[#allocation2 + $0x28] sm:$0xff] }
 0x545   : > { %2262 = vrot.lane.b32.xlu2 %v2261_v23, %s2414_s30 }
 0x54a   : > { %v1107_v24 = vpop.f32.mrf.mxu2 }
 0x552   : > { %v1109_v7 = vpop.f32.mrf.mxu2 }
 0x56a   : > { %v1341_v25 = vpop.f32.mrf.mxu2 }
 0x56b   : > { %v2266_v26 = vpack.i.bf16 %v1341_v25, %v1107_v24 }
 0x56d   : > { %2267 = vrot.lane.b32.xlu1 %v2266_v26, %s2414_s30 }
 0x572   : > { %v1343_v22 = vpop.f32.mrf.mxu2 }
 0x57a   : > { %v1346_v57 = vpop.f32.mrf.mxu2 }
 0x57b   : > { %v2271_v27 = vpack.i.bf16 %v1346_v57, %v1343_v22 }
 0x57d   : > { %2272 = vrot.lane.b32.xlu2 %v2271_v27, %s2414_s30 }
 0x582   : > { %v1348_v30 = vpop.f32.mrf.mxu2 }
 0x59f   : > { %v2263_v31 = vpop.permute.xlu2 %2262 }
 0x5a0   : > { %v2265_v33 = vunpack.i.h.bf16 %v2263_v31  ;;  %v2264_v34 = vunpack.i.l.bf16 %v2263_v31 }
 0x5a2   : > { %v1124_v35 = vsel %vm894_vm8, %v994_v61, %v2265_v33  ;;  %v1123_v37 = vsel %vm894_vm8, %v992_v58, %v2264_v34 }
 0x5a3   : > { %v1365_v38 = vpack.c.bf16 %v1124_v35, %v1123_v37 }
 0x5a5   : > { %2153 = vmatmul.msk.bf16.vlgmr.msra.gmra.mxu1 %vm655_vm3, %v1365_v38 }
 0x5b4   : > { %v1231_v39 = vpop.f32.mrf.mxu3 }
 0x5bc   : > { %v1233_v40 = vpop.f32.mrf.mxu3 }
 0x5c4   : > { %v1236_v41 = vpop.f32.mrf.mxu3 }
 0x5cc   : > { %v1238_v42 = vpop.f32.mrf.mxu3 }
 0x5d7   : > { %v2273_v53 = vpop.permute.xlu2 %2272 }
 0x5d8   : > { %v2275_v4 = vunpack.i.h.bf16 %v2273_v53  ;;  %v2274_v44 = vunpack.i.l.bf16 %v2273_v53 }
 0x5da   : > { %v1363_v32 = vsel %vm894_vm8, %v1233_v40, %v2274_v44  ;;  %v1364_v47 = vsel %vm894_vm8, %v1236_v41, %v2275_v4 }
 0x5db   : > { %v1367_v49 = vpack.c.bf16 %v1364_v47, %v1363_v32  ;;  %v2217_v47 = vld [vmem:[%s2528_s27 + $0x8] sm:$0xff] }
 0x5dc   : > { %1614 = vmatpush.bf16.msra.mxu3 %v2217_v47 }
 0x5df   : > { %v2268_v45 = vpop.permute.xlu1 %2267 }
 0x5e0   : > { %v2270_v46 = vunpack.i.h.bf16 %v2268_v45  ;;  %v2269_v29 = vunpack.i.l.bf16 %v2268_v45 }
 0x5e2   : > { %v1125_v43 = vsel %vm894_vm8, %v997_v9, %v2269_v29  ;;  %v1362_v48 = vsel %vm894_vm8, %v1231_v39, %v2270_v46 }
 0x5e3   : > { %v1366_v51 = vpack.c.bf16 %v1362_v48, %v1125_v43 }
 0x5e5   : > { %2154 = vmatmul.msk.bf16.gmra.mxu1 %vm655_vm3, %v1366_v51 }
 0x5f5   : > { %2155 = vmatmul.msk.bf16.gmra.mxu1 %vm655_vm3, %v1367_v49 }
 0x622   : > { %v1402_v56 = vpop.f32.mrf.mxu1 }
 0x623   : > { %v1417_v60 = vadd.f32 %v2363_v59, %v1402_v56  ;;  %v2216_v59 = vld [vmem:[%s2528_s27] sm:$0xff] }
 0x624   : > { %1615 = vmatpush.bf16.msra.mxu3 %v2216_v59 }
 0x625   : > { %v2890_v50 = vadd.f32 %v1423_v54, %v1417_v60 }
 0x627   : > { %v1430_v1 = vsel %vm655_vm3, %v2890_v50, 0.0 }
 0x628   : > { %1431 = vadd.xlane.f32.xlu1 %v1430_v1 }
 0x62a   : > { %v1404_v62 = vpop.f32.mrf.mxu1 }
 0x62b   : > { %v1418_v63 = vadd.f32 %v2364_v3, %v1404_v62 }
 0x62d   : > { %v2894_v0 = vadd.f32 %v1423_v54, %v1418_v63 }
 0x62f   : > { %v1433_v58 = vsel %vm655_vm3, %v2894_v0, 0.0 }
 0x630   : > { %1434 = vadd.xlane.f32.xlu2 %v1433_v58 }
 0x662   : > { %v1407_v8 = vpop.f32.mrf.mxu1 }
 0x663   : > { %v1419_v6 = vadd.f32 %v2365_v55, %v1407_v8 }
 0x665   : > { %v2898_v61 = vadd.f32 %v1423_v54, %v1419_v6 }
 0x667   : > { %v1436_v9 = vsel %vm655_vm3, %v2898_v61, 0.0 }
 0x668   : > { %1437 = vadd.xlane.f32.xlu0 %v1436_v9 }
 0x66a   : > { %v1409_v11 = vpop.f32.mrf.mxu1 }
 0x66b   : > { %v1420_v13 = vadd.f32 %v2366_v12, %v1409_v11 }
 0x66d   : > { %v2902_v5 = vadd.f32 %v1423_v54, %v1420_v13 }
 0x66f   : > { %v1439_v14 = vsel %vm655_vm3, %v2902_v5, 0.0 }
 0x670   : > { %1440 = vadd.xlane.f32.xlu0 %v1439_v14 }
 0x672   : > { %v1412_v10 = vpop.f32.mrf.mxu1 }
 0x673   : > { %v1421_v16 = vadd.f32 %v2367_v15, %v1412_v10  ;;  %v2961_v15 = vld [vmem:[%s2512_s14] sm:$0xff] }
 0x675   : > { %v2906_v17 = vadd.f32 %v1423_v54, %v1421_v16  ;;  %v2964_v16 = vperm.slane %v2961_v15, 2 }
 0x677   : > { %v1442_v18 = vsel %vm655_vm3, %v2906_v17, 0.0 }
 0x678   : > { %1443 = vadd.xlane.f32.xlu0 %v1442_v18 }
 0x67a   : > { %v1414_v19 = vpop.f32.mrf.mxu1 }
 0x67b   : > { %v1422_v20 = vadd.f32 %v2368_v21, %v1414_v19 }
 0x67d   : > { %v2910_v2 = vadd.f32 %v1423_v54, %v1422_v20  ;;  %v2968_v20 = vperm.slane %v2961_v15, 3 }
 0x67f   : > { %v1445_v23 = vsel %vm655_vm3, %v2910_v2, 0.0 }
 0x680   : > { %1446 = vadd.xlane.f32.xlu0 %v1445_v23 }
 0x69b   : > { %v1432_v24 = vpop.xlane.xlu1 %1431 }
 0x69c   : > { %v1448_v7 = vmul.f32 %v1432_v24, %v2589_v52 }
 0x69e   : > { %v2916_v36 = vsub.f32 %v2890_v50, %v1448_v7 }
 0x6a0   : > { %v1460_v25 = vmul.f32 %v2916_v36, %v2916_v36 }
 0x6a2   : > { %v1466_v26 = vsel %vm655_vm3, %v1460_v25, 0.0 }
 0x6a3   : > { %v1435_v22 = vpop.xlane.xlu2 %1434  ;;  %1467 = vadd.xlane.f32.xlu0 %v1466_v26 }
 0x6a4   : > { %v1449_v57 = vmul.f32 %v1435_v22, %v2589_v52 }
 0x6a6   : > { %v2923_v27 = vsub.f32 %v2894_v0, %v1449_v57 }
 0x6a8   : > { %v1461_v28 = vmul.f32 %v2923_v27, %v2923_v27 }
 0x6aa   : > { %v1469_v30 = vsel %vm655_vm3, %v1461_v28, 0.0 }
 0x6ab   : > { %1470 = vadd.xlane.f32.xlu1 %v1469_v30 }
 0x6db   : > { %v1438_v31 = vpop.xlane.xlu0 %1437 }
 0x6dc   : > { %v1450_v33 = vmul.f32 %v1438_v31, %v2589_v52 }
 0x6de   : > { %v2930_v34 = vsub.f32 %v2898_v61, %v1450_v33 }
 0x6e0   : > { %v1462_v35 = vmul.f32 %v2930_v34, %v2930_v34 }
 0x6e2   : > { %v1472_v37 = vsel %vm655_vm3, %v1462_v35, 0.0 }
 0x6e3   : > { %1473 = vadd.xlane.f32.xlu2 %v1472_v37  ;;  %v1441_v38 = vpop.xlane.xlu0 %1440 }
 0x6e4   : > { %v1451_v39 = vmul.f32 %v1441_v38, %v2589_v52 }
 0x6e6   : > { %v2937_v40 = vsub.f32 %v2902_v5, %v1451_v39 }
 0x6e8   : > { %v1463_v41 = vmul.f32 %v2937_v40, %v2937_v40 }
 0x6ea   : > { %v1475_v42 = vsel %vm655_vm3, %v1463_v41, 0.0 }
 0x6eb   : > { %1476 = vadd.xlane.f32.xlu0 %v1475_v42  ;;  %v1444_v45 = vpop.xlane.xlu0 %1443 }
 0x6ec   : > { %v1452_v46 = vmul.f32 %v1444_v45, %v2589_v52 }
 0x6ee   : > { %v2944_v29 = vsub.f32 %v2906_v17, %v1452_v46 }
 0x6f0   : > { %v1464_v43 = vmul.f32 %v2944_v29, %v2944_v29 }
 0x6f2   : > { %v1478_v48 = vsel %vm655_vm3, %v1464_v43, 0.0 }
 0x6f3   : > { %1479 = vadd.xlane.f32.xlu1 %v1478_v48  ;;  %v1447_v51 = vpop.xlane.xlu0 %1446 }
 0x6f4   : > { %v1453_v53 = vmul.f32 %v1447_v51, %v2589_v52 }
 0x6f6   : > { %v2951_v4 = vsub.f32 %v2910_v2, %v1453_v53 }
 0x6f8   : > { %v1465_v44 = vmul.f32 %v2951_v4, %v2951_v4 }
 0x6fa   : > { %v1481_v32 = vsel %vm655_vm3, %v1465_v44, 0.0 }
 0x6fb   : > { %1482 = vadd.xlane.f32.xlu2 %v1481_v32 }
 0x716   : > { %v1468_v49 = vpop.xlane.xlu0 %1467 }
 0x717   : > { %v1484_v54 = vmul.f32 %v1468_v49, %v2589_v52 }
 0x719   : > { %v1490_v56 = vadd.f32 1e-06, %v1484_v54 }
 0x71b   : > { %2339 = vrsqrt.f32 %v1490_v56  ;;  %vm1502_vm13 = vweird.f32 %v1490_v56 }
 0x71e   : > { %v1471_v60 = vpop.xlane.xlu1 %1470 }
 0x71f   : > { %v1485_v1 = vmul.f32 %v1471_v60, %v2589_v52 }
 0x721   : > { %v2340_v62 = vpop.eup %2339  ;;  %v1491_v3 = vadd.f32 1e-06, %v1485_v1 }
 0x722   : > { %v1497_v63 = vmul.f32 %v2340_v62, %v1490_v56  ;;  %vm1503_vm12 = vweird.f32 %v2340_v62 }
 0x723   : > { %2341 = vrsqrt.f32 %v1491_v3  ;;  %vm1504_vm14 = vmor %vm1502_vm13, %vm1503_vm12  ;;  %vm1512_vm0 = vweird.f32 %v1491_v3 }
 0x724   : > { %v1498_v58 = vmul.f32 %v2340_v62, %v1497_v63 }
 0x726   : > { %v1499_v8 = vmul.f32 0.5, %v1498_v58 }
 0x728   : > { %v1500_v55 = vsub.f32 1.5, %v1499_v8 }
 0x729   : > { %v2342_v6 = vpop.eup %2341 }
 0x72a   : > { %v1501_v9 = vmul.f32 %v2340_v62, %v1500_v55  ;;  %v1507_v11 = vmul.f32 %v2342_v6, %v1491_v3  ;;  %vm1513_vm15 = vweird.f32 %v2342_v6 }
 0x72b   : > { %vm1514_vm1 = vmor %vm1512_vm0, %vm1513_vm15 }
 0x72c   : > { %v1508_v12 = vmul.f32 %v2342_v6, %v1507_v11  ;;  %v1505_v13 = vsel %vm1504_vm14, %v2340_v62, %v1501_v9 }
 0x72d   : > { %v1556_v18 = vmul.f32 %v1505_v13, %v2916_v36 }
 0x72e   : > { %v1509_v14 = vmul.f32 0.5, %v1508_v12 }
 0x72f   : > { %v1563_v23 = vmul.f32 %v2964_v16, %v1556_v18 }
 0x730   : > { %v1510_v10 = vsub.f32 1.5, %v1509_v14 }
 0x731   : > { %v1570_v25 = vadd.f32 %v2968_v20, %v1563_v23 }
 0x732   : > { %v1511_v19 = vmul.f32 %v2342_v6, %v1510_v10 }
 0x734   : > { %v1515_v21 = vsel %vm1514_vm1, %v2342_v6, %v1511_v19 }
 0x735   : > { %v1557_v24 = vmul.f32 %v1515_v21, %v2923_v27 }
 0x737   : > { %v1564_v7 = vmul.f32 %v2964_v16, %v1557_v24 }
 0x739   : > { %v1571_v26 = vadd.f32 %v2968_v20, %v1564_v7 }
 0x73b   : > { %v1576_v22 = vpack.c.bf16 %v1571_v26, %v1570_v25 }
 0x73d   : > { %2164 = vmatmul.msk.bf16.vlgmr.msra.gmra.mxu3 %vm655_vm3, %v1576_v22 }
 0x756   : > { %v1474_v36 = vpop.xlane.xlu2 %1473 }
 0x757   : > { %v1486_v57 = vmul.f32 %v1474_v36, %v2589_v52 }
 0x759   : > { %v1492_v28 = vadd.f32 1e-06, %v1486_v57  ;;  %v2225_v57 = vld [vmem:[%s2534_s13 + $0x38] sm:$0xff] }
 0x75a   : > { %1754 = vmatpush.bf16.msra.mxu0 %v2225_v57 }
 0x75b   : > { %2343 = vrsqrt.f32 %v1492_v28  ;;  %vm1522_vm4 = vweird.f32 %v1492_v28 }
 0x75e   : > { %v1477_v30 = vpop.xlane.xlu0 %1476 }
 0x75f   : > { %v1487_v31 = vmul.f32 %v1477_v30, %v2589_v52  ;;  %v2222_v30 = vld [vmem:[%s2534_s13 + $0x20] sm:$0xff] }
 0x761   : > { %v2344_v33 = vpop.eup %2343  ;;  %v1493_v35 = vadd.f32 1e-06, %v1487_v31  ;;  %v2221_v31 = vld [vmem:[%s2534_s13 + $0x18] sm:$0xff] }
 0x762   : > { %v1517_v27 = vmul.f32 %v2344_v33, %v1492_v28  ;;  %vm1523_vm2 = vweird.f32 %v2344_v33  ;;  %v2224_v28 = vld [vmem:[%s2534_s13 + $0x30] sm:$0xff] }
 0x763   : > { %2345 = vrsqrt.f32 %v1493_v35  ;;  %vm1524_vm5 = vmor %vm1522_vm4, %vm1523_vm2  ;;  %vm1532_vm7 = vweird.f32 %v1493_v35  ;;  %1755 = vmatpush.bf16.msra.mxu0 %v2224_v28 }
 0x764   : > { %v1518_v37 = vmul.f32 %v2344_v33, %v1517_v27  ;;  %v2218_v27 = vld [vmem:[%s2534_s13] sm:$0xff] }
 0x766   : > { %v1519_v38 = vmul.f32 0.5, %v1518_v37  ;;  %v1480_v39 = vpop.xlane.xlu1 %1479 }
 0x767   : > { %v1488_v41 = vmul.f32 %v1480_v39, %v2589_v52 }
 0x768   : > { %v1520_v42 = vsub.f32 1.5, %v1519_v38 }
 0x769   : > { %v2346_v45 = vpop.eup %2345  ;;  %v1494_v46 = vadd.f32 1e-06, %v1488_v41 }
 0x76a   : > { %v1521_v43 = vmul.f32 %v2344_v33, %v1520_v42  ;;  %v1527_v48 = vmul.f32 %v2346_v45, %v1493_v35  ;;  %vm1533_vm6 = vweird.f32 %v2346_v45 }
 0x76b   : > { %2347 = vrsqrt.f32 %v1494_v46  ;;  %vm1534_vm8 = vmor %vm1532_vm7, %vm1533_vm6  ;;  %vm1542_vm10 = vweird.f32 %v1494_v46 }
 0x76c   : > { %v1528_v51 = vmul.f32 %v2346_v45, %v1527_v48  ;;  %v1525_v53 = vsel %vm1524_vm5, %v2344_v33, %v1521_v43  ;;  %v2219_v33 = vld [vmem:[%s2534_s13 + $0x8] sm:$0xff] }
 0x76d   : > { %v1558_v56 = vmul.f32 %v1525_v53, %v2930_v34 }
 0x76e   : > { %v1529_v44 = vmul.f32 0.5, %v1528_v51  ;;  %v1483_v32 = vpop.xlane.xlu2 %1482 }
 0x76f   : > { %v1489_v47 = vmul.f32 %v1483_v32, %v2589_v52  ;;  %v1565_v58 = vmul.f32 %v2964_v16, %v1558_v56 }
 0x770   : > { %v1530_v49 = vsub.f32 1.5, %v1529_v44 }
 0x771   : > { %v2348_v54 = vpop.eup %2347  ;;  %v1495_v59 = vadd.f32 1e-06, %v1489_v47  ;;  %v1572_v11 = vadd.f32 %v2968_v20, %v1565_v58 }
 0x772   : > { %v1531_v60 = vmul.f32 %v2346_v45, %v1530_v49  ;;  %v1537_v1 = vmul.f32 %v2348_v54, %v1494_v46  ;;  %vm1543_vm9 = vweird.f32 %v2348_v54 }
 0x773   : > { %2349 = vrsqrt.f32 %v1495_v59  ;;  %vm1544_vm11 = vmor %vm1542_vm10, %vm1543_vm9  ;;  %vm1552_vm13 = vweird.f32 %v1495_v59 }
 0x774   : > { %v1535_v62 = vsel %vm1534_vm8, %v2346_v45, %v1531_v60  ;;  %v1538_v3 = vmul.f32 %v2348_v54, %v1537_v1 }
 0x775   : > { %v1559_v63 = vmul.f32 %v1535_v62, %v2937_v40 }
 0x776   : > { %v1539_v8 = vmul.f32 0.5, %v1538_v3 }
 0x777   : > { %v1566_v55 = vmul.f32 %v2964_v16, %v1559_v63 }
 0x778   : > { %v1540_v6 = vsub.f32 1.5, %v1539_v8 }
 0x779   : > { %v2350_v9 = vpop.eup %2349  ;;  %v1573_v34 = vadd.f32 %v2968_v20, %v1566_v55 }
 0x77a   : > { %v1541_v12 = vmul.f32 %v2348_v54, %v1540_v6  ;;  %v1547_v13 = vmul.f32 %v2350_v9, %v1495_v59  ;;  %vm1553_vm12 = vweird.f32 %v2350_v9 }
 0x77b   : > { %v1577_v14 = vpack.c.bf16 %v1573_v34, %v1572_v11  ;;  %vm1554_vm14 = vmor %vm1552_vm13, %vm1553_vm12 }
 0x77c   : > { %v1548_v10 = vmul.f32 %v2350_v9, %v1547_v13  ;;  %v1545_v40 = vsel %vm1544_vm11, %v2348_v54, %v1541_v12 }
 0x77d   : > { %2165 = vmatmul.msk.bf16.gmra.mxu3 %vm655_vm3, %v1577_v14  ;;  %v1560_v21 = vmul.f32 %v1545_v40, %v2944_v29 }
 0x77e   : > { %v1549_v18 = vmul.f32 0.5, %v1548_v10 }
 0x77f   : > { %v1567_v25 = vmul.f32 %v2964_v16, %v1560_v21 }
 0x780   : > { %v1550_v19 = vsub.f32 1.5, %v1549_v18 }
 0x781   : > { %v1574_v22 = vadd.f32 %v2968_v20, %v1567_v25 }
 0x782   : > { %v1551_v23 = vmul.f32 %v2350_v9, %v1550_v19 }
 0x784   : > { %v1555_v24 = vsel %vm1554_vm14, %v2350_v9, %v1551_v23 }
 0x785   : > { %v1561_v7 = vmul.f32 %v1555_v24, %v2951_v4  ;;  %v2223_v4 = vld [vmem:[%s2534_s13 + $0x28] sm:$0xff] }
 0x786   : > { %1756 = vmatpush.bf16.msra.mxu0 %v2223_v4 }
 0x787   : > { %v1568_v26 = vmul.f32 %v2964_v16, %v1561_v7  ;;  %v2220_v16 = vld [vmem:[%s2534_s13 + $0x10] sm:$0xff] }
 0x789   : > { %v1575_v36 = vadd.f32 %v2968_v20, %v1568_v26  ;;  %v2276_v20 = vld [vmem:[%s517_s29] ss:$0 sm:$0xff] }
 0x78a   : > { %1757 = vmatpush.bf16.msra.mxu0 %v2222_v30 }
 0x78b   : > { %v1578_v29 = vpack.c.bf16 %v1575_v36, %v1574_v22 }
 0x78d   : > { %2166 = vmatmul.msk.bf16.gmra.mxu3 %vm655_vm3, %v1578_v29 }
 0x78e   : > { %1758 = vmatpush.bf16.msra.mxu0 %v2221_v31 }
 0x792   : > { %1759 = vmatpush.bf16.msra.mxu0 %v2220_v16 }
 0x796   : > { %1760 = vmatpush.bf16.msra.mxu0 %v2219_v33 }
 0x79a   : > { %1761 = vmatpush.bf16.msra.mxu0 %v2218_v27 }
 0x7c0   : > { %v1617_v35 = vpop.f32.mrf.mxu3 }
 0x7c1   : > { %v1618_v37 = vadd.f32 %v2276_v20, %v1617_v35 }
 0x7c3   : > { %v1632_v38 = vmul.f32 %v1618_v37, %v1618_v37 }
 0x7c5   : > { %v1638_v39 = vmul.f32 %v1632_v38, %v1618_v37 }
 0x7c7   : > { %v1644_v41 = vmul.f32 0.044715, %v1638_v39 }
 0x7c8   : > { %v1619_v42 = vpop.f32.mrf.mxu3 }
 0x7c9   : > { %v1650_v45 = vadd.f32 %v1644_v41, %v1618_v37  ;;  %v1620_v46 = vadd.f32 %v2276_v20, %v1619_v42 }
 0x7cb   : > { %v1656_v43 = vmul.f32 0.7978846, %v1650_v45  ;;  %v1633_v48 = vmul.f32 %v1620_v46, %v1620_v46 }
 0x7cd   : > { %v1639_v51 = vmul.f32 %v1633_v48, %v1620_v46  ;;  %2351 = vtanh.f32 %v1656_v43 }
 0x7cf   : > { %v1645_v53 = vmul.f32 0.044715, %v1639_v51 }
 0x7d1   : > { %v1651_v44 = vadd.f32 %v1645_v53, %v1620_v46 }
 0x7d3   : > { %v1657_v32 = vmul.f32 0.7978846, %v1651_v44  ;;  %v2352_v47 = vpop.eup %2351 }
 0x7d4   : > { %v1668_v49 = vadd.f32 1.0, %v2352_v47 }
 0x7d5   : > { %2353 = vtanh.f32 %v1657_v32  ;;  %v1705_v32 = vperm.slane %v2961_v15, 7 }
 0x7d6   : > { %v1674_v56 = vmul.f32 0.5, %v1668_v49 }
 0x7d8   : > { %v1680_v1 = vmul.f32 %v1674_v56, %v1618_v37 }
 0x7db   : > { %v2354_v54 = vpop.eup %2353 }
 0x7dc   : > { %v1669_v59 = vadd.f32 1.0, %v2354_v54 }
 0x7de   : > { %v1675_v60 = vmul.f32 0.5, %v1669_v59 }
 0x7e0   : > { %v1681_v62 = vmul.f32 %v1675_v60, %v1620_v46 }
 0x7e2   : > { %v1686_v3 = vpack.c.bf16 %v1681_v62, %v1680_v1 }
 0x7e4   : > { %1762 = vmatmul.bf16.vlgmr.msra.gmra.mxu0 %v1686_v3 }
 0x800   : > { %v1622_v63 = vpop.f32.mrf.mxu3 }
 0x801   : > { %v1623_v58 = vadd.f32 %v2276_v20, %v1622_v63 }
 0x803   : > { %v1634_v8 = vmul.f32 %v1623_v58, %v1623_v58 }
 0x805   : > { %v1640_v55 = vmul.f32 %v1634_v8, %v1623_v58 }
 0x807   : > { %v1646_v6 = vmul.f32 0.044715, %v1640_v55 }
 0x808   : > { %v1624_v9 = vpop.f32.mrf.mxu3 }
 0x809   : > { %v1652_v11 = vadd.f32 %v1646_v6, %v1623_v58  ;;  %v1625_v34 = vadd.f32 %v2276_v20, %v1624_v9 }
 0x80b   : > { %v1635_v12 = vmul.f32 %v1625_v34, %v1625_v34  ;;  %v1658_v13 = vmul.f32 0.7978846, %v1652_v11 }
 0x80d   : > { %v1641_v14 = vmul.f32 %v1635_v12, %v1625_v34  ;;  %2355 = vtanh.f32 %v1658_v13 }
 0x80f   : > { %v1647_v10 = vmul.f32 0.044715, %v1641_v14 }
 0x810   : > { %v1627_v40 = vpop.f32.mrf.mxu3 }
 0x811   : > { %v1653_v18 = vadd.f32 %v1647_v10, %v1625_v34  ;;  %v1628_v19 = vadd.f32 %v2276_v20, %v1627_v40 }
 0x813   : > { %v1636_v21 = vmul.f32 %v1628_v19, %v1628_v19  ;;  %v1659_v23 = vmul.f32 0.7978846, %v1653_v18  ;;  %v2356_v24 = vpop.eup %2355 }
 0x814   : > { %v1670_v22 = vadd.f32 1.0, %v2356_v24 }
 0x815   : > { %v1642_v7 = vmul.f32 %v1636_v21, %v1628_v19  ;;  %2357 = vtanh.f32 %v1659_v23 }
 0x816   : > { %v1676_v31 = vmul.f32 0.5, %v1670_v22 }
 0x817   : > { %v1648_v25 = vmul.f32 0.044715, %v1642_v7 }
 0x818   : > { %v1629_v26 = vpop.f32.mrf.mxu3  ;;  %v1682_v27 = vmul.f32 %v1676_v31, %v1623_v58 }
 0x819   : > { %v1654_v36 = vadd.f32 %v1648_v25, %v1628_v19  ;;  %v1630_v29 = vadd.f32 %v2276_v20, %v1629_v26 }
 0x81b   : > { %v2358_v57 = vpop.eup %2357  ;;  %v1637_v28 = vmul.f32 %v1630_v29, %v1630_v29  ;;  %v1660_v4 = vmul.f32 0.7978846, %v1654_v36 }
 0x81c   : > { %v1671_v30 = vadd.f32 1.0, %v2358_v57 }
 0x81d   : > { %v1643_v16 = vmul.f32 %v1637_v28, %v1630_v29  ;;  %2359 = vtanh.f32 %v1660_v4 }
 0x81e   : > { %v1677_v33 = vmul.f32 0.5, %v1671_v30 }
 0x81f   : > { %v1649_v35 = vmul.f32 0.044715, %v1643_v16 }
 0x820   : > { %v1683_v37 = vmul.f32 %v1677_v33, %v1625_v34 }
 0x821   : > { %v1655_v38 = vadd.f32 %v1649_v35, %v1630_v29 }
 0x822   : > { %v1687_v39 = vpack.c.bf16 %v1683_v37, %v1682_v27 }
 0x823   : > { %v1661_v41 = vmul.f32 0.7978846, %v1655_v38  ;;  %v2360_v42 = vpop.eup %2359 }
 0x824   : > { %1767 = vmatmul.bf16.gmra.mxu0 %v1687_v39  ;;  %v1672_v45 = vadd.f32 1.0, %v2360_v42 }
 0x825   : > { %2361 = vtanh.f32 %v1661_v41 }
 0x826   : > { %v1678_v43 = vmul.f32 0.5, %v1672_v45 }
 0x828   : > { %v1684_v51 = vmul.f32 %v1678_v43, %v1628_v19 }
 0x82b   : > { %v2362_v46 = vpop.eup %2361 }
 0x82c   : > { %v1673_v20 = vadd.f32 1.0, %v2362_v46 }
 0x82e   : > { %v1679_v48 = vmul.f32 0.5, %v1673_v20 }
 0x830   : > { %v1685_v53 = vmul.f32 %v1679_v48, %v1630_v29 }
 0x832   : > { %v1688_v44 = vpack.c.bf16 %v1685_v53, %v1684_v51 }
 0x834   : > { %1772 = vmatmul.bf16.gmra.mxu0 %v1688_v44 }
 0x861   : > { %v1763_v47 = vpop.f32.mrf.mxu0 }
 0x862   : > { %v1764_v49 = vadd.f32 %v1763_v47, %v1705_v32 }
 0x864   : > { %v1778_v54 = vadd.f32 %v1764_v49, %v2890_v50 }
 0x866   : > { %1784 = vst.msk [vmem:[#allocation2] sm:$0xff] %vm655_vm3, %v1778_v54 }
 0x869   : > { %v1765_v56 = vpop.f32.mrf.mxu0 }
 0x86a   : > { %v1766_v59 = vadd.f32 %v1765_v56, %v1705_v32 }
 0x86c   : > { %v1779_v60 = vadd.f32 %v1766_v59, %v2894_v0 }
 0x86e   : > { %1785 = vst.msk [vmem:[#allocation2 + $0x8] sm:$0xff] %vm655_vm3, %v1779_v60 }
 0x8a1   : > { %v1768_v1 = vpop.f32.mrf.mxu0 }
 0x8a2   : > { %v1769_v62 = vadd.f32 %v1768_v1, %v1705_v32 }
 0x8a4   : > { %v1780_v3 = vadd.f32 %v1769_v62, %v2898_v61 }
 0x8a6   : > { %1786 = vst.msk [vmem:[#allocation2 + $0x10] sm:$0xff] %vm655_vm3, %v1780_v3 }
 0x8a9   : > { %v1770_v63 = vpop.f32.mrf.mxu0 }
 0x8aa   : > { %v1771_v15 = vadd.f32 %v1770_v63, %v1705_v32 }
 0x8ac   : > { %v1781_v58 = vadd.f32 %v1771_v15, %v2902_v5 }
 0x8ae   : > { %1787 = vst.msk [vmem:[#allocation2 + $0x18] sm:$0xff] %vm655_vm3, %v1781_v58 }
 0x8b1   : > { %v1773_v50 = vpop.f32.mrf.mxu0 }
 0x8b2   : > { %v1774_v8 = vadd.f32 %v1773_v50, %v1705_v32 }
 0x8b4   : > { %v1782_v55 = vadd.f32 %v1774_v8, %v2906_v17 }
 0x8b6   : > { %1788 = vst.msk [vmem:[#allocation2 + $0x20] sm:$0xff] %vm655_vm3, %v1782_v55 }
 0x8b9   : > { %v1775_v0 = vpop.f32.mrf.mxu0 }
 0x8ba   : > { %v1776_v6 = vadd.f32 %v1775_v0, %v1705_v32  ;;  %1793 = sbr.rel (%p2199_p6) target bundleno = 2525 (0x9dd), region = 76 }
 0x8bc   : > { %v1783_v9 = vadd.f32 %v1776_v6, %v2910_v2 }
 0x8be   : > { %1789 = vst.msk [vmem:[#allocation2 + $0x28] sm:$0xff] %vm655_vm3, %v1783_v9 }
 0x8bf   : > { %v1808_v61 = vsel %vm655_vm3, %v1782_v55, 0.0  ;;  %v1802_v5 = vsel %vm655_vm3, %v1780_v3, 0.0  ;;  %v1796_v11 = vsel %vm655_vm3, %v1778_v54, 0.0  ;;  %v1811_v17 = vsel %vm655_vm3, %v1783_v9, 0.0 }
 0x8c0   : > { %1809 = vadd.xlane.f32.xlu2 %v1808_v61  ;;  %1803 = vadd.xlane.f32.xlu1 %v1802_v5  ;;  %v1805_v34 = vsel %vm655_vm3, %v1781_v58, 0.0  ;;  %v1799_v2 = vsel %vm655_vm3, %v1779_v60, 0.0 }
 0x8c1   : > { %1797 = vadd.xlane.f32.xlu0 %v1796_v11 }
 0x8c8   : > { %1812 = vadd.xlane.f32.xlu2 %v1811_v17  ;;  %1806 = vadd.xlane.f32.xlu1 %v1805_v34 }
 0x8c9   : > { %1800 = vadd.xlane.f32.xlu0 %v1799_v2 }
 0x933   : > { %v1810_v12 = vpop.xlane.xlu2 %1809  ;;  %v1804_v13 = vpop.xlane.xlu1 %1803 }
 0x934   : > { %v1816_v14 = vmul.f32 %v1804_v13, %v2589_v52  ;;  %v1798_v10 = vpop.xlane.xlu0 %1797  ;;  %v1818_v30 = vmul.f32 %v1810_v12, %v2589_v52  ;;  %v3085_v12 = vld [vmem:[%s3145_s5] ss:$0 sm:$0xff] }
 0x935   : > { %v1814_v40 = vmul.f32 %v1798_v10, %v2589_v52 }
 0x936   : > { %v3029_v18 = vsub.f32 %v1780_v3, %v1816_v14  ;;  %v3057_v38 = vsub.f32 %v1782_v55, %v1818_v30 }
 0x937   : > { %v3031_v19 = vsub.f32 %v1778_v54, %v1814_v40 }
 0x938   : > { %v1828_v21 = vmul.f32 %v3029_v18, %v3029_v18  ;;  %v1830_v41 = vmul.f32 %v3057_v38, %v3057_v38 }
 0x939   : > { %v1826_v23 = vmul.f32 %v3031_v19, %v3031_v19 }
 0x93a   : > { %v1838_v24 = vsel %vm655_vm3, %v1828_v21, 0.0  ;;  %v1844_v42 = vsel %vm655_vm3, %v1830_v41, 0.0 }
 0x93b   : > { %v1813_v7 = vpop.xlane.xlu2 %1812  ;;  %1839 = vadd.xlane.f32.xlu2 %v1838_v24  ;;  %v1807_v25 = vpop.xlane.xlu1 %1806  ;;  %v1832_v26 = vsel %vm655_vm3, %v1826_v23, 0.0  ;;  %v2371_v23 = vld [vmem:[%s3145_s5 + $0x1] ss:$0 sm:$0xff] }
 0x93c   : > { %v1819_v22 = vmul.f32 %v1813_v7, %v2589_v52  ;;  %v1817_v36 = vmul.f32 %v1807_v25, %v2589_v52  ;;  %1833 = vadd.xlane.f32.xlu0 %v1832_v26  ;;  %v1801_v29 = vpop.xlane.xlu0 %1800 }
 0x93d   : > { %v1815_v57 = vmul.f32 %v1801_v29, %v2589_v52 }
 0x93e   : > { %v3042_v28 = vsub.f32 %v1783_v9, %v1819_v22  ;;  %v3044_v4 = vsub.f32 %v1781_v58, %v1817_v36 }
 0x93f   : > { %v3047_v31 = vsub.f32 %v1779_v60, %v1815_v57 }
 0x940   : > { %v1831_v16 = vmul.f32 %v3042_v28, %v3042_v28  ;;  %v1829_v33 = vmul.f32 %v3044_v4, %v3044_v4 }
 0x941   : > { %v1827_v35 = vmul.f32 %v3047_v31, %v3047_v31 }
 0x942   : > { %v1847_v27 = vsel %vm655_vm3, %v1831_v16, 0.0  ;;  %v1841_v37 = vsel %vm655_vm3, %v1829_v33, 0.0 }
 0x943   : > { %1848 = vadd.xlane.f32.xlu2 %v1847_v27  ;;  %v1835_v39 = vsel %vm655_vm3, %v1827_v35, 0.0 }
 0x944   : > { %1842 = vadd.xlane.f32.xlu0 %v1841_v37  ;;  %1836 = vadd.xlane.f32.xlu1 %v1835_v39 }
 0x94c   : > { %1845 = vadd.xlane.f32.xlu1 %v1844_v42 }
 0x9ae   : > { %v1840_v45 = vpop.xlane.xlu2 %1839 }
 0x9af   : > { %v1852_v46 = vmul.f32 %v1840_v45, %v2589_v52  ;;  %v1834_v20 = vpop.xlane.xlu0 %1833 }
 0x9b0   : > { %v1850_v43 = vmul.f32 %v1834_v20, %v2589_v52 }
 0x9b1   : > { %v1858_v48 = vadd.f32 1e-06, %v1852_v46 }
 0x9b2   : > { %v1856_v51 = vadd.f32 1e-06, %v1850_v43 }
 0x9b3   : > { %2372 = vrsqrt.f32 %v1858_v48  ;;  %vm1888_vm15 = vweird.f32 %v1858_v48 }
 0x9b4   : > { %2374 = vrsqrt.f32 %v1856_v51  ;;  %vm1868_vm4 = vweird.f32 %v1856_v51 }
 0x9b6   : > { %v1849_v53 = vpop.xlane.xlu2 %1848 }
 0x9b7   : > { %v1855_v44 = vmul.f32 %v1849_v53, %v2589_v52  ;;  %v1837_v32 = vpop.xlane.xlu1 %1836  ;;  %v1843_v47 = vpop.xlane.xlu0 %1842 }
 0x9b8   : > { %v1851_v49 = vmul.f32 %v1837_v32, %v2589_v52  ;;  %v1853_v54 = vmul.f32 %v1843_v47, %v2589_v52 }
 0x9b9   : > { %v2373_v56 = vpop.eup %2372  ;;  %v3068_v59 = vadd.f32 1e-06, %v1855_v44 }
 0x9ba   : > { %v2375_v60 = vpop.eup %2374  ;;  %v1883_v1 = vmul.f32 %v2373_v56, %v1858_v48  ;;  %v3070_v62 = vadd.f32 1e-06, %v1851_v49  ;;  %v3072_v3 = vadd.f32 1e-06, %v1853_v54  ;;  %vm1889_vm0 = vweird.f32 %v2373_v56 }
 0x9bb   : > { %v1863_v63 = vmul.f32 %v2375_v60, %v1856_v51  ;;  %2376 = vrsqrt.f32 %v3068_v59  ;;  %vm1869_vm1 = vweird.f32 %v2375_v60  ;;  %vm1890_vm2 = vmor %vm1888_vm15, %vm1889_vm0  ;;  %vm1918_vm6 = vweird.f32 %v3068_v59 }
 0x9bc   : > { %v1884_v15 = vmul.f32 %v2373_v56, %v1883_v1  ;;  %2378 = vrsqrt.f32 %v3070_v62  ;;  %vm1870_vm5 = vmor %vm1868_vm4, %vm1869_vm1  ;;  %vm1898_vm9 = vweird.f32 %v3072_v3  ;;  %vm1878_vm12 = vweird.f32 %v3070_v62 }
 0x9bd   : > { %v1864_v58 = vmul.f32 %v2375_v60, %v1863_v63  ;;  %2380 = vrsqrt.f32 %v3072_v3 }
 0x9be   : > { %v1885_v50 = vmul.f32 0.5, %v1884_v15 }
 0x9bf   : > { %v1865_v8 = vmul.f32 0.5, %v1864_v58  ;;  %v1846_v55 = vpop.xlane.xlu1 %1845 }
 0x9c0   : > { %v1886_v0 = vsub.f32 1.5, %v1885_v50  ;;  %v1854_v6 = vmul.f32 %v1846_v55, %v2589_v52 }
 0x9c1   : > { %v2377_v9 = vpop.eup %2376  ;;  %v1866_v61 = vsub.f32 1.5, %v1865_v8 }
 0x9c2   : > { %v2379_v5 = vpop.eup %2378  ;;  %v1887_v11 = vmul.f32 %v2373_v56, %v1886_v0  ;;  %v1913_v17 = vmul.f32 %v2377_v9, %v3068_v59  ;;  %v3080_v34 = vadd.f32 1e-06, %v1854_v6  ;;  %vm1919_vm7 = vweird.f32 %v2377_v9 }
 0x9c3   : > { %v2381_v2 = vpop.eup %2380  ;;  %v1867_v13 = vmul.f32 %v2375_v60, %v1866_v61  ;;  %v1873_v52 = vmul.f32 %v2379_v5, %v3070_v62  ;;  %vm1879_vm8 = vweird.f32 %v2379_v5  ;;  %vm1920_vm11 = vmor %vm1918_vm6, %vm1919_vm7 }
 0x9c4   : > { %v1891_v14 = vsel %vm1890_vm2, %v2373_v56, %v1887_v11  ;;  %v1914_v10 = vmul.f32 %v2377_v9, %v1913_v17  ;;  %v1893_v40 = vmul.f32 %v2381_v2, %v3072_v3  ;;  %2382 = vrsqrt.f32 %v3080_v34  ;;  %vm1880_vm13 = vmor %vm1878_vm12, %vm1879_vm8 }
 0x9c5   : > { %v1924_v21 = vmul.f32 %v1891_v14, %v3029_v18  ;;  %v1871_v24 = vsel %vm1870_vm5, %v2375_v60, %v1867_v13  ;;  %v1874_v7 = vmul.f32 %v2379_v5, %v1873_v52  ;;  %vm1899_vm10 = vweird.f32 %v2381_v2 }
 0x9c6   : > { %v1922_v25 = vmul.f32 %v1871_v24, %v3031_v19  ;;  %v1915_v26 = vmul.f32 0.5, %v1914_v10  ;;  %v1894_v22 = vmul.f32 %v2381_v2, %v1893_v40  ;;  %vm1900_vm14 = vmor %vm1898_vm9, %vm1899_vm10  ;;  %vm1908_vm0 = vweird.f32 %v3080_v34 }
 0x9c7   : > { %v1931_v36 = vmul.f32 %v3085_v12, %v1924_v21  ;;  %v1875_v29 = vmul.f32 0.5, %v1874_v7 }
 0x9c8   : > { %v1929_v18 = vmul.f32 %v3085_v12, %v1922_v25  ;;  %v1916_v57 = vsub.f32 1.5, %v1915_v26  ;;  %v1895_v30 = vmul.f32 0.5, %v1894_v22 }
 0x9c9   : > { %v1938_v19 = vadd.f32 %v2371_v23, %v1931_v36  ;;  %v1876_v16 = vsub.f32 1.5, %v1875_v29 }
 0x9ca   : > { %v1936_v33 = vadd.f32 %v2371_v23, %v1929_v18  ;;  %v1917_v35 = vmul.f32 %v2377_v9, %v1916_v57  ;;  %v1896_v27 = vsub.f32 1.5, %v1895_v30  ;;  %v2383_v37 = vpop.eup %2382 }
 0x9cb   : > { %1947 = vst.msk [vmem:[%s3100_s19 + $0x10] sm:$0xff] %vm655_vm3, %v1938_v19  ;;  %v1877_v39 = vmul.f32 %v2379_v5, %v1876_v16  ;;  %v1903_v45 = vmul.f32 %v2383_v37, %v3080_v34  ;;  %vm1909_vm15 = vweird.f32 %v2383_v37 }
 0x9cc   : > { %1945 = vst.msk [vmem:[%s3100_s19] sm:$0xff] %vm655_vm3, %v1936_v33  ;;  %v1921_v41 = vsel %vm1920_vm11, %v2377_v9, %v1917_v35  ;;  %v1897_v42 = vmul.f32 %v2381_v2, %v1896_v27  ;;  %vm1910_vm1 = vmor %vm1908_vm0, %vm1909_vm15 }
 0x9cd   : > { %v1927_v46 = vmul.f32 %v1921_v41, %v3042_v28  ;;  %v1881_v20 = vsel %vm1880_vm13, %v2379_v5, %v1877_v39  ;;  %v1904_v51 = vmul.f32 %v2383_v37, %v1903_v45 }
 0x9ce   : > { %v1923_v43 = vmul.f32 %v1881_v20, %v3047_v31  ;;  %v1901_v48 = vsel %vm1900_vm14, %v2381_v2, %v1897_v42 }
 0x9cf   : > { %v1934_v53 = vmul.f32 %v3085_v12, %v1927_v46  ;;  %v1925_v44 = vmul.f32 %v1901_v48, %v3044_v4  ;;  %v1905_v47 = vmul.f32 0.5, %v1904_v51 }
 0x9d0   : > { %v1930_v32 = vmul.f32 %v3085_v12, %v1923_v43 }
 0x9d1   : > { %v1941_v49 = vadd.f32 %v2371_v23, %v1934_v53  ;;  %v1932_v28 = vmul.f32 %v3085_v12, %v1925_v44  ;;  %v1906_v56 = vsub.f32 1.5, %v1905_v47 }
 0x9d2   : > { %v1937_v54 = vadd.f32 %v2371_v23, %v1930_v32 }
 0x9d3   : > { %1950 = vst.msk [vmem:[%s3100_s19 + $0x28] sm:$0xff] %vm655_vm3, %v1941_v49  ;;  %v1939_v31 = vadd.f32 %v2371_v23, %v1932_v28  ;;  %v1907_v59 = vmul.f32 %v2383_v37, %v1906_v56 }
 0x9d4   : > { %1946 = vst.msk [vmem:[%s3100_s19 + $0x8] sm:$0xff] %vm655_vm3, %v1937_v54 }
 0x9d5   : > { %1948 = vst.msk [vmem:[%s3100_s19 + $0x18] sm:$0xff] %vm655_vm3, %v1939_v31  ;;  %v1911_v4 = vsel %vm1910_vm1, %v2383_v37, %v1907_v59 }
 0x9d6   : > { %v1926_v60 = vmul.f32 %v1911_v4, %v3057_v38 }
 0x9d8   : > { %v1933_v1 = vmul.f32 %v3085_v12, %v1926_v60 }
 0x9da   : > { %v1940_v62 = vadd.f32 %v2371_v23, %v1933_v1 }
 0x9dc   : > { %1949 = vst.msk [vmem:[%s3100_s19 + $0x20] sm:$0xff] %vm655_vm3, %v1940_v62 }
 0x9dd PF: > { %s3158_s20 = sld [smem:[#allocation4_spill]] }
 0x9de   : > { %s3159_s21 = sld [smem:[#allocation3_spill]] }
 0x9df   : > { %s3160_s22 = sld [smem:[#allocation5_spill]] }
 0x9e3   : > { %s22_s23 = sadd.s32 1, %s3158_s20  }
 0x9e4   : > { %p19_p7 = scmp.ge.s32.totalorder %s22_s23, 5  }
 0x9e6   :  { %21 = sbr.rel (!%p19_p7) target bundleno = 2 (0x2), region = 125 }

</bundles_post_ra>
